<compile_context>
chip_gen: v6e
topology: v6e:2x2x1
jax: 0.10.0
libtpu: 0.0.40
codegen_flags: <defaults>
</compile_context>

<pallas_src>
import functools

import jax
import jax.numpy as jnp
from jax.experimental import pallas as pl
from jax.experimental.pallas import tpu as pltpu

DROPOUT_P = 0.2
IN_F, H1, H2, H3, OUT_F = 9, 64, 256, 64, 1


def _mlp_dropout_kernel(xt_ref, m1_ref, m2_ref, m3_ref,
                        w1_ref, b1_ref, w2_ref, b2_ref,
                        w3_ref, b3_ref, w4_ref, b4_ref,
                        o_ref, *, scale):
    """One batch tile, feature-major: activations are [features, TILE_B]."""
    xt = xt_ref[...]                                                      # [9, TB] f32

    # layer1 + fused ReLU * dropout (int8 {0,1} mask, inverted-dropout scale)
    h = jnp.dot(w1_ref[...], xt, preferred_element_type=jnp.float32) + b1_ref[...]
    h = jnp.maximum(h, 0.0) * (m1_ref[...].astype(jnp.float32) * scale)   # [64, TB]

    # layer2 + fused ReLU * dropout
    h = jnp.dot(w2_ref[...], h, preferred_element_type=jnp.float32) + b2_ref[...]
    h = jnp.maximum(h, 0.0) * (m2_ref[...].astype(jnp.float32) * scale)   # [256, TB]

    # layer3 + fused ReLU * dropout
    h = jnp.dot(w3_ref[...], h, preferred_element_type=jnp.float32) + b3_ref[...]
    h = jnp.maximum(h, 0.0) * (m3_ref[...].astype(jnp.float32) * scale)   # [64, TB]

    # layer4 (no activation, no dropout) -> lane-dense [1, TILE_B] store
    out = jnp.dot(w4_ref[...], h, preferred_element_type=jnp.float32) + b4_ref[...]
    o_ref[...] = out.astype(o_ref.dtype)


def make_dropout_masks(key, b_pad, p=DROPOUT_P):
    """int8 {0,1} keep masks (P(keep) = 1-p), feature-major [features, b_pad]."""
    k1, k2, k3 = jax.random.split(key, 3)

    def one(k, n):
        return jax.random.bernoulli(k, 1.0 - p, (n, b_pad)).astype(jnp.int8)

    return one(k1, H1), one(k2, H2), one(k3, H3)


def simple_convnet_dropout_forward(x, params, masks, *, dropout_p=DROPOUT_P, tile_b=128):
    """x: [B, 9] f32, params in torch layout ([out,in] weights, [out,1] biases),
    masks from make_dropout_masks (int8, feature-major).  Returns [B, 1] f32."""
    w1, b1, w2, b2, w3, b3, w4, b4 = params
    m1, m2, m3 = masks
    batch, feat = x.shape
    assert feat == IN_F

    n_tiles = pl.cdiv(batch, tile_b)
    b_pad = n_tiles * tile_b
    assert m1.shape == (H1, b_pad) and m2.shape == (H2, b_pad) and m3.shape == (H3, b_pad)

    # feature-major input, batch padded up to a multiple of the lane tile
    xt = jnp.pad(x.T, ((0, 0), (0, b_pad - batch)))                       # [9, b_pad]

    # batch-tiled operands: block index walks the lane (batch) axis
    def tiled(rows):
        return pl.BlockSpec((rows, tile_b), lambda i: (0, i))

    # weights/biases: whole array, constant index_map -> VMEM-resident across steps
    def resident(arr):
        return pl.BlockSpec(arr.shape, lambda i: (0, 0))

    in_specs = [
        tiled(IN_F),                        # xt
        tiled(H1), tiled(H2), tiled(H3),    # int8 dropout keep-masks
        resident(w1), resident(b1),
        resident(w2), resident(b2),
        resident(w3), resident(b3),
        resident(w4), resident(b4),
    ]
    out_specs = pl.BlockSpec((1, tile_b), lambda i: (0, i))               # lane-dense store

    kernel = functools.partial(_mlp_dropout_kernel,
                               scale=float(1.0 / (1.0 - dropout_p)))

    out_padded = pl.pallas_call(
        kernel,
        out_shape=jax.ShapeDtypeStruct((1, b_pad), jnp.float32),
        grid_spec=pltpu.PrefetchScalarGridSpec(
            num_scalar_prefetch=0,
            grid=(n_tiles,),
            in_specs=in_specs,
            out_specs=out_specs,
        ),
        compiler_params=pltpu.CompilerParams(
            dimension_semantics=("parallel",)),   # batch tiles shard across TCs on v7x
    )(xt, m1, m2, m3, w1, b1, w2, b2, w3, b3, w4, b4)

    return out_padded[0, :batch].reshape(batch, 1)


def init_params(key):
    """torch.nn.Linear default init, stored in torch layout [out,in] / [out,1]."""
    sizes = [(H1, IN_F), (H2, H1), (H3, H2), (OUT_F, H3)]
    params = []
    for (fan_out, fan_in) in sizes:
        key, kw, kb = jax.random.split(key, 3)
        bound = 1.0 / jnp.sqrt(fan_in)
        w = jax.random.uniform(kw, (fan_out, fan_in), jnp.float32, -bound, bound)
        b = jax.random.uniform(kb, (fan_out, 1), jnp.float32, -bound, bound)
        params += [w, b]
    return tuple(params)


def reference_forward(x, params, masks, batch, p=DROPOUT_P):
    """Pure-JAX reference using the exact same dropout masks."""
    w1, b1, w2, b2, w3, b3, w4, b4 = params
    m1, m2, m3 = masks
    s = 1.0 / (1.0 - p)
    h = jnp.maximum(x @ w1.T + b1[:, 0], 0.0) * (m1[:, :batch].T.astype(jnp.float32) * s)
    h = jnp.maximum(h @ w2.T + b2[:, 0], 0.0) * (m2[:, :batch].T.astype(jnp.float32) * s)
    h = jnp.maximum(h @ w3.T + b3[:, 0], 0.0) * (m3[:, :batch].T.astype(jnp.float32) * s)
    return h @ w4.T + b4[:, 0]


if __name__ == "__main__":
    key = jax.random.PRNGKey(0)
    key, kx, kp, kd = jax.random.split(key, 4)

    B = 300           # deliberately not a multiple of 128 to exercise padding
    TILE_B = 128      # grid = (3,)

    x = jax.random.normal(kx, (B, IN_F), dtype=jnp.float32)
    params = init_params(kp)

    b_pad = pl.cdiv(B, TILE_B) * TILE_B
    masks = make_dropout_masks(kd, b_pad, DROPOUT_P)

    out = simple_convnet_dropout_forward(x, params, masks,
                                         dropout_p=DROPOUT_P, tile_b=TILE_B)
    out = jax.block_until_ready(out)

    assert out.shape == (B, 1), out.shape
    assert out.dtype == jnp.float32, out.dtype

    ref = reference_forward(x, params, masks, B, DROPOUT_P)
    # loose tolerance: MXU default-precision f32 matmuls vs XLA reference
    max_err = float(jnp.max(jnp.abs(out - ref)))
    assert max_err < 5e-2, f"max abs error {max_err}"

    print("KERNEL_OK")
</pallas_src>

<mosaic_0001>
module attributes {stable_mosaic.version = 11 : i64} {
  func.func @_mlp_dropout_kernel(%arg0: i32, %arg1: memref<9x128xf32, #tpu.memory_space<vmem>>, %arg2: memref<64x128xi8, #tpu.memory_space<vmem>>, %arg3: memref<256x128xi8, #tpu.memory_space<vmem>>, %arg4: memref<64x128xi8, #tpu.memory_space<vmem>>, %arg5: memref<64x9xf32, #tpu.memory_space<vmem>>, %arg6: memref<64x1xf32, #tpu.memory_space<vmem>>, %arg7: memref<256x64xf32, #tpu.memory_space<vmem>>, %arg8: memref<256x1xf32, #tpu.memory_space<vmem>>, %arg9: memref<64x256xf32, #tpu.memory_space<vmem>>, %arg10: memref<64x1xf32, #tpu.memory_space<vmem>>, %arg11: memref<1x64xf32, #tpu.memory_space<vmem>>, %arg12: memref<1x1xf32, #tpu.memory_space<vmem>>, %arg13: memref<1x128xf32, #tpu.memory_space<vmem>>) attributes {dimension_semantics = [#tpu.dimension_semantics<parallel>], iteration_bounds = array<i64: 3>, scalar_prefetch = 0 : i64, scratch_operands = 0 : i64, tpu.core_type = #tpu.core_type<tc>, window_params = [{transform_indices = @transform_0, window_bounds = array<i64: 9, 128>}, {transform_indices = @transform_1, window_bounds = array<i64: 64, 128>}, {transform_indices = @transform_2, window_bounds = array<i64: 256, 128>}, {transform_indices = @transform_3, window_bounds = array<i64: 64, 128>}, {pipeline_mode = #tpu.pipeline_mode<synchronous>, transform_indices = @transform_4, window_bounds = array<i64: 64, 9>}, {pipeline_mode = #tpu.pipeline_mode<synchronous>, transform_indices = @transform_5, window_bounds = array<i64: 64, 1>}, {pipeline_mode = #tpu.pipeline_mode<synchronous>, transform_indices = @transform_6, window_bounds = array<i64: 256, 64>}, {pipeline_mode = #tpu.pipeline_mode<synchronous>, transform_indices = @transform_7, window_bounds = array<i64: 256, 1>}, {pipeline_mode = #tpu.pipeline_mode<synchronous>, transform_indices = @transform_8, window_bounds = array<i64: 64, 256>}, {pipeline_mode = #tpu.pipeline_mode<synchronous>, transform_indices = @transform_9, window_bounds = array<i64: 64, 1>}, {pipeline_mode = #tpu.pipeline_mode<synchronous>, transform_indices = @transform_10, window_bounds = array<i64: 1, 64>}, {pipeline_mode = #tpu.pipeline_mode<synchronous>, transform_indices = @transform_11, window_bounds = array<i64: 1, 1>}, {transform_indices = @transform_12, window_bounds = array<i64: 1, 128>}]} {
    %c0 = arith.constant 0 : index
    %c0_0 = arith.constant 0 : index
    %0 = vector.load %arg1[%c0, %c0_0] : memref<9x128xf32, #tpu.memory_space<vmem>>, vector<9x128xf32>
    %c0_1 = arith.constant 0 : index
    %c0_2 = arith.constant 0 : index
    %1 = vector.load %arg5[%c0_1, %c0_2] : memref<64x9xf32, #tpu.memory_space<vmem>>, vector<64x9xf32>
    %cst = arith.constant dense<0.000000e+00> : vector<64x128xf32>
    %2 = tpu.matmul %1, %0, %cst {dimension_numbers = #tpu.dot_dimension_numbers<[1], [0], [0], [1], [0, 0, 1, 1], [], []>} : vector<64x9xf32>, vector<9x128xf32>, vector<64x128xf32> -> vector<64x128xf32>
    %c0_3 = arith.constant 0 : index
    %c0_4 = arith.constant 0 : index
    %3 = vector.load %arg6[%c0_3, %c0_4] : memref<64x1xf32, #tpu.memory_space<vmem>>, vector<64x1xf32>
    %4 = vector.broadcast %3 : vector<64x1xf32> to vector<64x128xf32>
    %5 = arith.addf %2, %4 : vector<64x128xf32>
    %cst_5 = arith.constant 0.000000e+00 : f32
    %6 = vector.broadcast %cst_5 : f32 to vector<64x128xf32>
    %7 = arith.maximumf %5, %6 : vector<64x128xf32>
    %c0_6 = arith.constant 0 : index
    %c0_7 = arith.constant 0 : index
    %8 = vector.load %arg2[%c0_6, %c0_7] : memref<64x128xi8, #tpu.memory_space<vmem>>, vector<64x128xi8>
    %9 = arith.sitofp %8 : vector<64x128xi8> to vector<64x128xf32>
    %cst_8 = arith.constant 1.250000e+00 : f32
    %10 = vector.broadcast %cst_8 : f32 to vector<64x128xf32>
    %11 = arith.mulf %9, %10 : vector<64x128xf32>
    %12 = arith.mulf %7, %11 : vector<64x128xf32>
    %c0_9 = arith.constant 0 : index
    %c0_10 = arith.constant 0 : index
    %13 = vector.load %arg7[%c0_9, %c0_10] : memref<256x64xf32, #tpu.memory_space<vmem>>, vector<256x64xf32>
    %cst_11 = arith.constant dense<0.000000e+00> : vector<256x128xf32>
    %14 = tpu.matmul %13, %12, %cst_11 {dimension_numbers = #tpu.dot_dimension_numbers<[1], [0], [0], [1], [0, 0, 1, 1], [], []>} : vector<256x64xf32>, vector<64x128xf32>, vector<256x128xf32> -> vector<256x128xf32>
    %c0_12 = arith.constant 0 : index
    %c0_13 = arith.constant 0 : index
    %15 = vector.load %arg8[%c0_12, %c0_13] : memref<256x1xf32, #tpu.memory_space<vmem>>, vector<256x1xf32>
    %16 = vector.broadcast %15 : vector<256x1xf32> to vector<256x128xf32>
    %17 = arith.addf %14, %16 : vector<256x128xf32>
    %cst_14 = arith.constant 0.000000e+00 : f32
    %18 = vector.broadcast %cst_14 : f32 to vector<256x128xf32>
    %19 = arith.maximumf %17, %18 : vector<256x128xf32>
    %c0_15 = arith.constant 0 : index
    %c0_16 = arith.constant 0 : index
    %20 = vector.load %arg3[%c0_15, %c0_16] : memref<256x128xi8, #tpu.memory_space<vmem>>, vector<256x128xi8>
    %21 = arith.sitofp %20 : vector<256x128xi8> to vector<256x128xf32>
    %cst_17 = arith.constant 1.250000e+00 : f32
    %22 = vector.broadcast %cst_17 : f32 to vector<256x128xf32>
    %23 = arith.mulf %21, %22 : vector<256x128xf32>
    %24 = arith.mulf %19, %23 : vector<256x128xf32>
    %c0_18 = arith.constant 0 : index
    %c0_19 = arith.constant 0 : index
    %25 = vector.load %arg9[%c0_18, %c0_19] : memref<64x256xf32, #tpu.memory_space<vmem>>, vector<64x256xf32>
    %cst_20 = arith.constant dense<0.000000e+00> : vector<64x128xf32>
    %26 = tpu.matmul %25, %24, %cst_20 {dimension_numbers = #tpu.dot_dimension_numbers<[1], [0], [0], [1], [0, 0, 1, 1], [], []>} : vector<64x256xf32>, vector<256x128xf32>, vector<64x128xf32> -> vector<64x128xf32>
    %c0_21 = arith.constant 0 : index
    %c0_22 = arith.constant 0 : index
    %27 = vector.load %arg10[%c0_21, %c0_22] : memref<64x1xf32, #tpu.memory_space<vmem>>, vector<64x1xf32>
    %28 = vector.broadcast %27 : vector<64x1xf32> to vector<64x128xf32>
    %29 = arith.addf %26, %28 : vector<64x128xf32>
    %cst_23 = arith.constant 0.000000e+00 : f32
    %30 = vector.broadcast %cst_23 : f32 to vector<64x128xf32>
    %31 = arith.maximumf %29, %30 : vector<64x128xf32>
    %c0_24 = arith.constant 0 : index
    %c0_25 = arith.constant 0 : index
    %32 = vector.load %arg4[%c0_24, %c0_25] : memref<64x128xi8, #tpu.memory_space<vmem>>, vector<64x128xi8>
    %33 = arith.sitofp %32 : vector<64x128xi8> to vector<64x128xf32>
    %cst_26 = arith.constant 1.250000e+00 : f32
    %34 = vector.broadcast %cst_26 : f32 to vector<64x128xf32>
    %35 = arith.mulf %33, %34 : vector<64x128xf32>
    %36 = arith.mulf %31, %35 : vector<64x128xf32>
    %c0_27 = arith.constant 0 : index
    %c0_28 = arith.constant 0 : index
    %37 = vector.load %arg11[%c0_27, %c0_28] : memref<1x64xf32, #tpu.memory_space<vmem>>, vector<1x64xf32>
    %cst_29 = arith.constant dense<0.000000e+00> : vector<1x128xf32>
    %38 = tpu.matmul %37, %36, %cst_29 {dimension_numbers = #tpu.dot_dimension_numbers<[1], [0], [0], [1], [0, 0, 1, 1], [], []>} : vector<1x64xf32>, vector<64x128xf32>, vector<1x128xf32> -> vector<1x128xf32>
    %c0_30 = arith.constant 0 : index
    %c0_31 = arith.constant 0 : index
    %39 = vector.load %arg12[%c0_30, %c0_31] : memref<1x1xf32, #tpu.memory_space<vmem>>, vector<1x1xf32>
    %40 = vector.broadcast %39 : vector<1x1xf32> to vector<1x128xf32>
    %41 = arith.addf %38, %40 : vector<1x128xf32>
    %c0_32 = arith.constant 0 : index
    %c0_33 = arith.constant 0 : index
    %42 = vector.load %arg13[%c0_32, %c0_33] : memref<1x128xf32, #tpu.memory_space<vmem>>, vector<1x128xf32>
    tpu.vector_store %arg13[%c0_32, %c0_33], %41 {strides = array<i32>} : memref<1x128xf32, #tpu.memory_space<vmem>>, vector<1x128xf32>,
    return
  }
  func.func @transform_0(%arg0: i32) -> (i32, i32) {
    %c0_i32 = arith.constant 0 : i32
    %c0_i32_0 = arith.constant 0 : i32
    return %c0_i32, %arg0 : i32, i32
  }
  func.func @transform_1(%arg0: i32) -> (i32, i32) {
    %c0_i32 = arith.constant 0 : i32
    %c0_i32_0 = arith.constant 0 : i32
    return %c0_i32, %arg0 : i32, i32
  }
  func.func @transform_2(%arg0: i32) -> (i32, i32) {
    %c0_i32 = arith.constant 0 : i32
    %c0_i32_0 = arith.constant 0 : i32
    return %c0_i32, %arg0 : i32, i32
  }
  func.func @transform_3(%arg0: i32) -> (i32, i32) {
    %c0_i32 = arith.constant 0 : i32
    %c0_i32_0 = arith.constant 0 : i32
    return %c0_i32, %arg0 : i32, i32
  }
  func.func @transform_4(%arg0: i32) -> (i32, i32) {
    %c0_i32 = arith.constant 0 : i32
    %c0_i32_0 = arith.constant 0 : i32
    %c0_i32_1 = arith.constant 0 : i32
    return %c0_i32, %c0_i32_0 : i32, i32
  }
  func.func @transform_5(%arg0: i32) -> (i32, i32) {
    %c0_i32 = arith.constant 0 : i32
    %c0_i32_0 = arith.constant 0 : i32
    %c0_i32_1 = arith.constant 0 : i32
    return %c0_i32, %c0_i32_0 : i32, i32
  }
  func.func @transform_6(%arg0: i32) -> (i32, i32) {
    %c0_i32 = arith.constant 0 : i32
    %c0_i32_0 = arith.constant 0 : i32
    %c0_i32_1 = arith.constant 0 : i32
    return %c0_i32, %c0_i32_0 : i32, i32
  }
  func.func @transform_7(%arg0: i32) -> (i32, i32) {
    %c0_i32 = arith.constant 0 : i32
    %c0_i32_0 = arith.constant 0 : i32
    %c0_i32_1 = arith.constant 0 : i32
    return %c0_i32, %c0_i32_0 : i32, i32
  }
  func.func @transform_8(%arg0: i32) -> (i32, i32) {
    %c0_i32 = arith.constant 0 : i32
    %c0_i32_0 = arith.constant 0 : i32
    %c0_i32_1 = arith.constant 0 : i32
    return %c0_i32, %c0_i32_0 : i32, i32
  }
  func.func @transform_9(%arg0: i32) -> (i32, i32) {
    %c0_i32 = arith.constant 0 : i32
    %c0_i32_0 = arith.constant 0 : i32
    %c0_i32_1 = arith.constant 0 : i32
    return %c0_i32, %c0_i32_0 : i32, i32
  }
  func.func @transform_10(%arg0: i32) -> (i32, i32) {
    %c0_i32 = arith.constant 0 : i32
    %c0_i32_0 = arith.constant 0 : i32
    %c0_i32_1 = arith.constant 0 : i32
    return %c0_i32, %c0_i32_0 : i32, i32
  }
  func.func @transform_11(%arg0: i32) -> (i32, i32) {
    %c0_i32 = arith.constant 0 : i32
    %c0_i32_0 = arith.constant 0 : i32
    %c0_i32_1 = arith.constant 0 : i32
    return %c0_i32, %c0_i32_0 : i32, i32
  }
  func.func @transform_12(%arg0: i32) -> (i32, i32) {
    %c0_i32 = arith.constant 0 : i32
    %c0_i32_0 = arith.constant 0 : i32
    return %c0_i32, %arg0 : i32, i32
  }
}

</mosaic_0001>

<bundles_post_ra>
// kernel: tpu_custom_call.1
= control target key start
LH: loop header
LB: loop body
LE: loop exit
PB: predicated region body
PF: predicated region fallthrough
CT: control target
= control target key end

     0   :  { %s3218_s0 = inlined_call_operand.vmem [shape: f32[9,384], index: 0, kind: input, shape index: {}]   ;;  %s3219_s1 = inlined_call_operand.vmem [shape: s8[64,384], index: 1, kind: input, shape index: {}]   ;;  %s3220_s2 = inlined_call_operand.vmem [shape: s8[256,384], index: 2, kind: input, shape index: {}]   ;;  %s3221_s3 = inlined_call_operand.vmem [shape: s8[64,384], index: 3, kind: input, shape index: {}]   ;;  %s3222_s4 = inlined_call_operand.vmem [shape: f32[64,9], index: 4, kind: input, shape index: {}]   ;;  %s3223_s5 = inlined_call_operand.vmem [shape: f32[64,1], index: 5, kind: input, shape index: {}]   ;;  %s3224_s6 = inlined_call_operand.vmem [shape: f32[256,64], index: 6, kind: input, shape index: {}]   ;;  %s3225_s7 = inlined_call_operand.vmem [shape: f32[256,1], index: 7, kind: input, shape index: {}]   ;;  %s3226_s8 = inlined_call_operand.vmem [shape: f32[64,256], index: 8, kind: input, shape index: {}]   ;;  %s3227_s9 = inlined_call_operand.vmem [shape: f32[64,1], index: 9, kind: input, shape index: {}]   ;;  %s3228_s10 = inlined_call_operand.vmem [shape: f32[1,64], index: 10, kind: input, shape index: {}]   ;;  %s3229_s11 = inlined_call_operand.<no memory space> [shape: f32[1,1], index: 11, kind: input, shape index: {}]   ;;  %s3230_s12 = inlined_call_operand.hbm [shape: f32[1,384], index: 12, kind: output, shape index: {}]  }
   0x1   :  { %v17_v0 = vstv %s3229_s11 }
   0x2   :  { %18 = vst [vmem:[#allocation2] sm:$0x1] %v17_v0 }
   0x3   :  { %19 = vsyncpa [#allocation8], 0 }
   0x4   :  { %21 = vsyncpa [#allocation8 + $0x1], 0  ;;  %s2478_s23 = smov 0   ;;  %s2480_s24 = smov 0  }
   0x5   :  { %s2482_s25 = smov 0   ;;  %s2484_s26 = smov 0  }
   0x6 LB: > { %s3231_s11 = sadd.s32 4294967295, %s2404_s26   ;;  %s2025_s27 = sadd.s32 4294967294, %s2404_s26   ;;  %s2404_s26 = sphi %s2484_s26, %s3304_s26   ;;  %s2400_s25 = sphi %s2482_s25, %s3308_s25   ;;  %s2396_s24 = sphi %s2480_s24, %s3307_s24   ;;  %s2392_s23 = sphi %s2478_s23, %s3306_s23  }
   0x7   : > { %s2501_s28 = sadd.s32 1, %s2404_s26   ;;  %s34_s29 = sadd.s32 1, %s2400_s25 }
   0x8   : > { %3236 = sst [smem:[#allocation10_spill]] %s2501_s28  ;;  %s31_s30 = ssub.s32 %s2404_s26, %s2501_s28 }
   0x9   : > { %p41_p0 = scmp.ne.s32.totalorder %s2400_s25, %s2396_s24  ;;  %p32_p1 = scmp.eq.s32.totalorder %s31_s30, 0 }
   0xa   : > { %p42_p2 = scmp.eq.s32.totalorder %s2404_s26, 0  ;;  %p317_p3 = scmp.eq.s32.totalorder %s3231_s11, 2 }
   0xb   : > { %p322_p4 = scmp.ne.s32.totalorder %s2396_s24, %s2392_s23  ;;  %p323_p7 = scmp.eq.s32.totalorder %s2025_s27, 2 }
   0xc   : > { %s2514_s13 = scalar_select %p32_p1, %s2400_s25, %s34_s29  }
   0xd   : > { %p2516_p5 = por %p42_p2, %p41_p0  ;;  %p2520_p6 = por %p317_p3, %p41_p0 }
   0xe   : > { %3237 = sst [smem:[#allocation11_spill]] %s2514_s13  ;;  %p2524_p8 = por %p323_p7, %p322_p4 }
   0xf   : > { %p2027_p9 = scmp.ge.s32.totalorder %s2404_s26, 3 }
  0x11   : > { %363 = sbr.rel (%p2027_p9) target bundleno = 45 (0x2d), region = 48 }
  0x16   : > { %366 = sbr.rel (!%p2516_p5) target bundleno = 27 (0x1b), region = 52  ;;  %s368_s17 = sand.u32 (%p2516_p5), 1, %s2400_s25  }
  0x17   : > { %s2029_s18 = sshll.u32 (%p2516_p5), %s2404_s26, 3  ;;  %s2028_s19 = sshll.u32 (%p2516_p5), %s368_s17, 4 }
  0x18   : > { %s372_s22 = scalar_lea.vmem (%p2516_p5), %s3218_s0, %s2029_s18  ;;  %s370_s27 = scalar_lea.vmem (%p2516_p5), [#allocation3], %s2028_s19 }
  0x19   : > { %v403_v1 = vld [vmem:[%s372_s22] sm:$0xff] (%p2516_p5)  ;;  %v405_v2 = vld [vmem:[%s372_s22 + $0x18] sm:$0xff] (%p2516_p5) }
  0x1a   : > { %404 = vst [vmem:[%s370_s27] sm:$0xff] (%p2516_p5), %v403_v1  ;;  %406 = vst [vmem:[%s370_s27 + $0x8] sm:$0xff] (%p2516_p5), %v405_v2 }
  0x1b PF: > { %412 = sbr.rel (!%p2516_p5) target bundleno = 32 (0x20), region = 90  ;;  %s414_s29 = sand.u32 (%p2516_p5), 1, %s2400_s25  }
  0x1c   : > { %s2031_s30 = sshll.u32 (%p2516_p5), %s2404_s26, 3  ;;  %s2030_s11 = sshll.u32 (%p2516_p5), %s414_s29, 4 }
  0x1d   : > { %s418_s28 = scalar_lea.vmem (%p2516_p5), %s3219_s1, %s2031_s30  ;;  %s416_s18 = scalar_lea.vmem (%p2516_p5), [#allocation4], %s2030_s11 }
  0x1e   : > { %v449_v3 = vld [vmem:[%s418_s28] sm:$0xff] (%p2516_p5)  ;;  %v451_v4 = vld [vmem:[%s418_s28 + $0x18] sm:$0xff] (%p2516_p5) }
  0x1f   : > { %450 = vst [vmem:[%s416_s18] sm:$0xff] (%p2516_p5), %v449_v3  ;;  %452 = vst [vmem:[%s416_s18 + $0x8] sm:$0xff] (%p2516_p5), %v451_v4 }
  0x20 PF: > { %458 = sbr.rel (!%p2516_p5) target bundleno = 40 (0x28), region = 128  ;;  %s460_s19 = sand.u32 (%p2516_p5), 1, %s2400_s25  }
  0x21   : > { %s2033_s20 = sshll.u32 (%p2516_p5), %s2404_s26, 3  ;;  %s2032_s21 = sshll.u32 (%p2516_p5), %s460_s19, 6 }
  0x22   : > { %s464_s29 = scalar_lea.vmem (%p2516_p5), %s3220_s2, %s2033_s20  ;;  %s462_s28 = scalar_lea.vmem (%p2516_p5), [#allocation5], %s2032_s21 }
  0x23   : > { %v507_v5 = vld [vmem:[%s464_s29] sm:$0xff] (%p2516_p5)  ;;  %v509_v6 = vld [vmem:[%s464_s29 + $0x18] sm:$0xff] (%p2516_p5)  ;;  %v511_v7 = vld [vmem:[%s464_s29 + $0x30] sm:$0xff] (%p2516_p5) }
  0x24   : > { %508 = vst [vmem:[%s462_s28] sm:$0xff] (%p2516_p5), %v507_v5  ;;  %510 = vst [vmem:[%s462_s28 + $0x8] sm:$0xff] (%p2516_p5), %v509_v6  ;;  %v513_v8 = vld [vmem:[%s464_s29 + $0x48] sm:$0xff] (%p2516_p5)  ;;  %v515_v9 = vld [vmem:[%s464_s29 + $0x60] sm:$0xff] (%p2516_p5) }
  0x25   : > { %512 = vst [vmem:[%s462_s28 + $0x10] sm:$0xff] %v511_v7  ;;  %v517_v10 = vld [vmem:[%s464_s29 + $0x78] sm:$0xff]  ;;  %514 = vst [vmem:[%s462_s28 + $0x18] sm:$0xff] %v513_v8  ;;  %v519_v11 = vld [vmem:[%s464_s29 + $0x90] sm:$0xff] }
  0x26   : > { %516 = vst [vmem:[%s462_s28 + $0x20] sm:$0xff] %v515_v9  ;;  %518 = vst [vmem:[%s462_s28 + $0x28] sm:$0xff] %v517_v10  ;;  %v521_v12 = vld [vmem:[%s464_s29 + $0xa8] sm:$0xff] }
  0x27   : > { %520 = vst [vmem:[%s462_s28 + $0x30] sm:$0xff] %v519_v11  ;;  %522 = vst [vmem:[%s462_s28 + $0x38] sm:$0xff] %v521_v12 }
  0x28 PF: > { %528 = sbr.rel (!%p2516_p5) target bundleno = 45 (0x2d), region = 166  ;;  %s530_s11 = sand.u32 (%p2516_p5), 1, %s2400_s25  }
  0x29   : > { %s2035_s13 = sshll.u32 (%p2516_p5), %s2404_s26, 3  ;;  %s2034_s30 = sshll.u32 (%p2516_p5), %s530_s11, 4 }
  0x2a   : > { %s534_s19 = scalar_lea.vmem (%p2516_p5), %s3221_s3, %s2035_s13  ;;  %s532_s20 = scalar_lea.vmem (%p2516_p5), [#allocation6], %s2034_s30 }
  0x2b   : > { %v565_v13 = vld [vmem:[%s534_s19] sm:$0xff] (%p2516_p5)  ;;  %v567_v14 = vld [vmem:[%s534_s19 + $0x18] sm:$0xff] (%p2516_p5) }
  0x2c   : > { %566 = vst [vmem:[%s532_s20] sm:$0xff] (%p2516_p5), %v565_v13  ;;  %568 = vst [vmem:[%s532_s20 + $0x8] sm:$0xff] (%p2516_p5), %v567_v14 }
  0x2d PF: > { %p2036_p10 = scmp.ge.s32.totalorder %s2404_s26, 1  ;;  %p573_p11 = scmp.lt.s32.totalorder %s2404_s26, 4 }
  0x2f   : > { %p574_p12 = pnand %p2036_p10, %p573_p11 }
  0x31   : > { %577 = sbr.rel (%p574_p12) target bundleno = 1035 (0x40b), region = 204 }
  0x36   : > { %v670_v15 = vld [vmem:[%s3223_s5 + $0x38] sm:$0xff]  ;;  %v668_v16 = vld [vmem:[%s3223_s5 + $0x28] sm:$0xff]  ;;  %s2566_s29 = sand.u32 1, %s2396_s24   ;;  %v2406_v17 = vmov 0   ;;  %vm736_vm0 = vcmask 1040384   ;;  %v655_v18 = vld [vmem:[%s3222_s4] sm:$0xff] }
  0x37   : > { %2343 = vset.pattern.permute.xlu1 %v2406_v17  ;;  %2342 = vset.pattern.permute.xlu0 %v2406_v17  ;;  %s2569_s28 = sshll.u32 %s2566_s29, 4  ;;  %vm711_vm1 = vcmask 72704   ;;  %v669_v20 = vld [vmem:[%s3223_s5 + $0x30] sm:$0xff]  ;;  %v667_v21 = vld [vmem:[%s3223_s5 + $0x20] sm:$0xff]  ;;  %v656_v23 = vld [vmem:[%s3222_s4 + $0x8] sm:$0xff]  ;;  %vm1111_vm2 = vcmask 523264  }
  0x38   : > { %708 = vperm.xlu0 %2342, %v670_v15   ;;  %698 = vperm.xlu1 %2343, %v668_v16   ;;  %s582_s30 = scalar_lea.vmem [#allocation3], %s2569_s28  ;;  %v666_v24 = vld [vmem:[%s3223_s5 + $0x18] sm:$0xff]  ;;  %v665_v25 = vld [vmem:[%s3223_s5 + $0x10] sm:$0xff]  ;;  %v664_v28 = vld [vmem:[%s3223_s5 + $0x8] sm:$0xff]  ;;  %s589_s13 = scalar_lea.vmem [#allocation4], %s2569_s28  ;;  %vm2408_vm3 = vmmov 0  }
  0x39   : > { %v654_v19 = vld [vmem:[%s582_s30 + $0x8] sm:$0x1]  ;;  %2205 = vmatprep.mubr.msk.f32.mxu0 %vm711_vm1, %v655_v18  ;;  %v653_v22 = vld [vmem:[%s582_s30] sm:$0xff]  ;;  %v1813_v10 = vld [vmem:[#allocation2] sm:$0x1]  ;;  %s2039_s11 = sshll.u32 %s2566_s29, 6 }
  0x3a   : > { %2201 = vmatprep.subr.msk.mxu0 %vm736_vm0, %v654_v19  ;;  %v657_v26 = vld [vmem:[%s3222_s4 + $0x10] sm:$0xff]  ;;  %v658_v27 = vld [vmem:[%s3222_s4 + $0x18] sm:$0xff]  ;;  %v663_v29 = vld [vmem:[%s3223_s5] sm:$0xff]  ;;  %s603_s27 = scalar_lea.vmem [#allocation6], %s2569_s28  ;;  %s652_s18 = scalar_lea.vmem [#allocation7], %s2566_s29 }
  0x3b   : > { %2202 = vmatpush3.msk.msra.mxu0 %vm736_vm0, %v654_v19  ;;  %v659_v30 = vld [vmem:[%s3222_s4 + $0x20] sm:$0xff]  ;;  %v660_v31 = vld [vmem:[%s3222_s4 + $0x28] sm:$0xff]  ;;  %v950_v32 = vld [vmem:[%s3225_s7 + $0xf8] sm:$0xff]  ;;  %s1910_s30 = sshll.u32 %s652_s18, 4  ;;  %s1898_s21 = scalar_lea.sflag [#allocation8], %s2566_s29  ;;  %s1911_s30 = int_to_ptr.vmem [resolvable:$true] %s1910_s30 }
  0x3c   : > { %703 = vperm.xlu0 %2342, %v669_v20   ;;  %693 = vperm.xlu1 %2343, %v667_v21   ;;  %v934_v33 = vld [vmem:[%s3225_s7 + $0x78] sm:$0xff]  ;;  %v661_v34 = vld [vmem:[%s3222_s4 + $0x30] sm:$0xff]  ;;  %v948_v38 = vld [vmem:[%s3225_s7 + $0xe8] sm:$0xff]  ;;  %s2344_s22 = scalar_lea.vmem %s1911_s30, 16 }
  0x3d   : > { %2203 = vmatprep.subr.mxu0 %v653_v22  ;;  %v662_v35 = vld [vmem:[%s3222_s4 + $0x38] sm:$0xff]  ;;  %v949_v36 = vld [vmem:[%s3225_s7 + $0xf0] sm:$0xff]  ;;  %v932_v39 = vld [vmem:[%s3225_s7 + $0x68] sm:$0xff]  ;;  %p2345_p13 = scmp.ne.s32.totalorder %s1911_s30, %s2344_s22 }
  0x3e   : > { %2204 = vmatpush3.msra.mxu0 %v653_v22  ;;  %v933_v37 = vld [vmem:[%s3225_s7 + $0x70] sm:$0xff]  ;;  %v947_v40 = vld [vmem:[%s3225_s7 + $0xe0] sm:$0xff]  ;;  %v946_v42 = vld [vmem:[%s3225_s7 + $0xd8] sm:$0xff] }
  0x3f   : > { %2206 = vmatmul.mubr.msk.f32.vlgmr.msra.gmra.mxu0 %vm711_vm1, %v656_v23  ;;  %v931_v41 = vld [vmem:[%s3225_s7 + $0x60] sm:$0xff]  ;;  %v930_v43 = vld [vmem:[%s3225_s7 + $0x58] sm:$0xff]  ;;  %v945_v44 = vld [vmem:[%s3225_s7 + $0xd0] sm:$0xff]  ;;  %p2346_p0 = pnand %p2345_p13, %p2520_p6 }
  0x40   : > { %688 = vperm.xlu0 %2342, %v666_v24   ;;  %683 = vperm.xlu1 %2343, %v665_v25   ;;  %v929_v45 = vld [vmem:[%s3225_s7 + $0x50] sm:$0xff]  ;;  %v944_v46 = vld [vmem:[%s3225_s7 + $0xc8] sm:$0xff]  ;;  %v943_v48 = vld [vmem:[%s3225_s7 + $0xc0] sm:$0xff] }
  0x41   : > { %2208 = vmatprep.mubr.msk.f32.mxu0 %vm711_vm1, %v657_v26  ;;  %v928_v47 = vld [vmem:[%s3225_s7 + $0x48] sm:$0xff]  ;;  %v927_v49 = vld [vmem:[%s3225_s7 + $0x40] sm:$0xff]  ;;  %v942_v50 = vld [vmem:[%s3225_s7 + $0xb8] sm:$0xff]  ;;  %p2347_p1 = pneg %p2346_p0 }
  0x42   : > { %v926_v51 = vld [vmem:[%s3225_s7 + $0x38] sm:$0xff]  ;;  %v941_v52 = vld [vmem:[%s3225_s7 + $0xb0] sm:$0xff]  ;;  %v940_v54 = vld [vmem:[%s3225_s7 + $0xa8] sm:$0xff] }
  0x43   : > { %2209 = vmatmul.mubr.msk.f32.gmra.mxu0 %vm711_vm1, %v658_v27  ;;  %v925_v53 = vld [vmem:[%s3225_s7 + $0x30] sm:$0xff]  ;;  %v924_v55 = vld [vmem:[%s3225_s7 + $0x28] sm:$0xff]  ;;  %v939_v56 = vld [vmem:[%s3225_s7 + $0xa0] sm:$0xff] }
  0x44   : > { %678 = vperm.xlu0 %2342, %v664_v28   ;;  %673 = vperm.xlu1 %2343, %v663_v29   ;;  %v923_v57 = vld [vmem:[%s3225_s7 + $0x20] sm:$0xff]  ;;  %v938_v58 = vld [vmem:[%s3225_s7 + $0x98] sm:$0xff]  ;;  %v937_v60 = vld [vmem:[%s3225_s7 + $0x90] sm:$0xff] }
  0x45   : > { %2211 = vmatprep.mubr.msk.f32.mxu0 %vm711_vm1, %v659_v30  ;;  %v922_v59 = vld [vmem:[%s3225_s7 + $0x18] sm:$0xff]  ;;  %v921_v61 = vld [vmem:[%s3225_s7 + $0x10] sm:$0xff]  ;;  %v936_v62 = vld [vmem:[%s3225_s7 + $0x88] sm:$0xff] }
  0x46   : > { %v920_v63 = vld [vmem:[%s3225_s7 + $0x8] sm:$0xff]  ;;  %v935_v0 = vld [vmem:[%s3225_s7 + $0x80] sm:$0xff]  ;;  %v1624_v2 = vld [vmem:[%s3227_s9 + $0x38] sm:$0xff] }
  0x47   : > { %2212 = vmatmul.mubr.msk.f32.gmra.mxu0 %vm711_vm1, %v660_v31  ;;  %v919_v1 = vld [vmem:[%s3225_s7] sm:$0xff]  ;;  %v1623_v3 = vld [vmem:[%s3227_s9 + $0x30] sm:$0xff]  ;;  %v1622_v4 = vld [vmem:[%s3227_s9 + $0x28] sm:$0xff] }
  0x48   : > { %1108 = vperm.xlu0 %2342, %v950_v32   ;;  %1028 = vperm.xlu1 %2343, %v934_v33   ;;  %v1621_v5 = vld [vmem:[%s3227_s9 + $0x20] sm:$0xff]  ;;  %v1620_v6 = vld [vmem:[%s3227_s9 + $0x18] sm:$0xff]  ;;  %v1619_v7 = vld [vmem:[%s3227_s9 + $0x10] sm:$0xff] }
  0x49   : > { %2214 = vmatprep.mubr.msk.f32.mxu0 %vm711_vm1, %v661_v34  ;;  %v1618_v8 = vld [vmem:[%s3227_s9 + $0x8] sm:$0xff]  ;;  %v1617_v9 = vld [vmem:[%s3227_s9] sm:$0xff] }
  0x4a   : > { %v887_v11 = vld [vmem:[%s3224_s6] sm:$0xff] }
  0x4b   : > { %2215 = vmatmul.mubr.msk.f32.gmra.mxu0 %vm711_vm1, %v662_v35  ;;  %2233 = vmatprep.mubr.msk.f32.mxu1 %vm1111_vm2, %v887_v11  ;;  %v854_v15 = vld [vmem:[%s589_s13 + $0x8] sm:$0xff]  ;;  %v853_v28 = vld [vmem:[%s589_s13] sm:$0xff]  ;;  %s2949_s13 = scalar_lea.vmem [#allocation5], %s2039_s11 }
  0x4c   : > { %1103 = vperm.xlu0 %2342, %v949_v36   ;;  %1023 = vperm.xlu1 %2343, %v933_v37   ;;  %v862_v18 = vunpack.c.3.s8 %v854_v15  ;;  %v861_v20 = vunpack.c.2.s8 %v854_v15  ;;  %v860_v23 = vunpack.c.1.s8 %v854_v15  ;;  %v859_v27 = vunpack.c.0.s8 %v854_v15  ;;  %v889_v15 = vld [vmem:[%s3224_s6 + $0x10] sm:$0xff] }
  0x4d   : > { %v858_v30 = vunpack.c.3.s8 %v853_v28  ;;  %v857_v37 = vunpack.c.2.s8 %v853_v28 }
  0x4e   : > { %v870_v24 = vcvt.s32.f32 %v862_v18  ;;  %v869_v29 = vcvt.s32.f32 %v861_v20  ;;  %v868_v31 = vcvt.s32.f32 %v860_v23  ;;  %v892_v18 = vld [vmem:[%s3224_s6 + $0x28] sm:$0xff]  ;;  %v894_v20 = vld [vmem:[%s3224_s6 + $0x38] sm:$0xff]  ;;  %v897_v23 = vld [vmem:[%s3224_s6 + $0x50] sm:$0xff] }
  0x50   : > { %1098 = vperm.xlu0 %2342, %v948_v38   ;;  %1018 = vperm.xlu1 %2343, %v932_v39   ;;  %v878_v35 = vmul.f32 1.25, %v870_v24  ;;  %v867_v38 = vcvt.s32.f32 %v859_v27  ;;  %v898_v24 = vld [vmem:[%s3224_s6 + $0x58] sm:$0xff]  ;;  %v901_v27 = vld [vmem:[%s3224_s6 + $0x70] sm:$0xff] }
  0x54   : > { %1093 = vperm.xlu0 %2342, %v947_v40   ;;  %1013 = vperm.xlu1 %2343, %v931_v41  }
  0x58   : > { %1088 = vperm.xlu0 %2342, %v946_v42   ;;  %1008 = vperm.xlu1 %2343, %v930_v43   ;;  %v877_v43 = vmul.f32 1.25, %v869_v29  ;;  %v903_v29 = vld [vmem:[%s3224_s6 + $0x80] sm:$0xff] }
  0x5c   : > { %1083 = vperm.xlu0 %2342, %v945_v44   ;;  %1003 = vperm.xlu1 %2343, %v929_v45   ;;  %v856_v45 = vunpack.c.1.s8 %v853_v28 }
  0x60   : > { %1078 = vperm.xlu0 %2342, %v944_v46   ;;  %998 = vperm.xlu1 %2343, %v928_v47   ;;  %v866_v46 = vcvt.s32.f32 %v858_v30  ;;  %v876_v47 = vmul.f32 1.25, %v868_v31  ;;  %v904_v30 = vld [vmem:[%s3224_s6 + $0x88] sm:$0xff]  ;;  %v905_v31 = vld [vmem:[%s3224_s6 + $0x90] sm:$0xff] }
  0x64   : > { %1073 = vperm.xlu0 %2342, %v943_v48   ;;  %993 = vperm.xlu1 %2343, %v927_v49  }
  0x68   : > { %1068 = vperm.xlu0 %2342, %v942_v50   ;;  %988 = vperm.xlu1 %2343, %v926_v51  }
  0x6c   : > { %1063 = vperm.xlu0 %2342, %v941_v52   ;;  %983 = vperm.xlu1 %2343, %v925_v53   ;;  %v855_v52 = vunpack.c.0.s8 %v853_v28  ;;  %v865_v53 = vcvt.s32.f32 %v857_v37  ;;  %v902_v28 = vld [vmem:[%s3224_s6 + $0x78] sm:$0xff]  ;;  %v911_v37 = vld [vmem:[%s3224_s6 + $0xc0] sm:$0xff] }
  0x70   : > { %1058 = vperm.xlu0 %2342, %v940_v54   ;;  %978 = vperm.xlu1 %2343, %v924_v55  }
  0x74   : > { %1053 = vperm.xlu0 %2342, %v939_v56   ;;  %973 = vperm.xlu1 %2343, %v923_v57   ;;  %v875_v56 = vmul.f32 1.25, %v867_v38  ;;  %v912_v38 = vld [vmem:[%s3224_s6 + $0xc8] sm:$0xff] }
  0x78   : > { %1048 = vperm.xlu0 %2342, %v938_v58   ;;  %968 = vperm.xlu1 %2343, %v922_v59   ;;  %v864_v59 = vcvt.s32.f32 %v856_v45  ;;  %v1602_v45 = vld [vmem:[%s3226_s8 + $0x8] sm:$0xff] }
  0x79   : > { %1729 = vmatprep.mubr.f32.mxu0 %v1602_v45 }
  0x7c   : > { %1043 = vperm.xlu0 %2342, %v937_v60   ;;  %963 = vperm.xlu1 %2343, %v921_v61  }
  0x80   : > { %1038 = vperm.xlu0 %2342, %v936_v62   ;;  %958 = vperm.xlu1 %2343, %v920_v63   ;;  %v874_v62 = vmul.f32 1.25, %v866_v46 }
  0x84   : > { %1033 = vperm.xlu0 %2342, %v935_v0   ;;  %953 = vperm.xlu1 %2343, %v919_v1   ;;  %v863_v1 = vcvt.s32.f32 %v855_v52 }
  0x88   : > { %1662 = vperm.xlu0 %2342, %v1624_v2   ;;  %1657 = vperm.xlu1 %2343, %v1623_v3  }
  0x8c   : > { %1652 = vperm.xlu0 %2342, %v1622_v4   ;;  %1647 = vperm.xlu1 %2343, %v1621_v5   ;;  %v873_v4 = vmul.f32 1.25, %v865_v53 }
  0x90   : > { %1642 = vperm.xlu0 %2342, %v1620_v6   ;;  %1637 = vperm.xlu1 %2343, %v1619_v7   ;;  %v872_v7 = vmul.f32 1.25, %v864_v59 }
  0x94   : > { %1632 = vperm.xlu0 %2342, %v1618_v8   ;;  %1627 = vperm.xlu1 %2343, %v1617_v9  }
  0x98   : > { %1816 = vperm.xlu0 %2342, %v1813_v10   ;;  %v871_v10 = vmul.f32 1.25, %v863_v1 }
  0xb3   : > { %v709_v13 = vpop.permute.xlu0 %708  ;;  %v699_v16 = vpop.permute.xlu1 %698 }
  0xb7   : > { %v704_v21 = vpop.permute.xlu0 %703  ;;  %v694_v25 = vpop.permute.xlu1 %693 }
  0xbb   : > { %v689_v36 = vpop.permute.xlu0 %688  ;;  %v684_v44 = vpop.permute.xlu1 %683 }
  0xbf   : > { %v679_v58 = vpop.permute.xlu0 %678  ;;  %v674_v0 = vpop.permute.xlu1 %673 }
  0xc3   : > { %v2874_v46 = vpop.permute.xlu0 %1108 }
  0xff   : > { %v2207_v12 = vpop.f32.mrf.mxu0 }
 0x100   : > { %v812_v60 = vadd.f32 %v2207_v12, %v679_v58 }
 0x101   : > { %v806_v14 = vpop.f32.mrf.mxu0 }
 0x102   : > { %v807_v2 = vadd.f32 %v806_v14, %v674_v0  ;;  %v846_v6 = vmax.f32 %v812_v60, 0.0  ;;  %v888_v14 = vld [vmem:[%s3224_s6 + $0x8] sm:$0xff] }
 0x103   : > { %v2210_v17 = vpop.f32.mrf.mxu0 }
 0x104   : > { %v822_v48 = vadd.f32 %v2210_v17, %v689_v36  ;;  %v845_v9 = vmax.f32 %v807_v2, 0.0  ;;  %v880_v12 = vmul.f32 %v872_v7, %v846_v6  ;;  %v891_v17 = vld [vmem:[%s3224_s6 + $0x20] sm:$0xff]  ;;  %v910_v36 = vld [vmem:[%s3224_s6 + $0xb8] sm:$0xff] }
 0x105   : > { %v816_v19 = vpop.f32.mrf.mxu0 }
 0x106   : > { %v817_v54 = vadd.f32 %v816_v19, %v684_v44  ;;  %v848_v61 = vmax.f32 %v822_v48, 0.0  ;;  %v893_v19 = vld [vmem:[%s3224_s6 + $0x30] sm:$0xff]  ;;  %v918_v44 = vld [vmem:[%s3224_s6 + $0xf8] sm:$0xff] }
 0x107   : > { %v2213_v22 = vpop.f32.mrf.mxu0 }
 0x108   : > { %v832_v33 = vadd.f32 %v2213_v22, %v699_v16  ;;  %v847_v3 = vmax.f32 %v817_v54, 0.0  ;;  %v882_v8 = vmul.f32 %v874_v62, %v848_v61  ;;  %v890_v16 = vld [vmem:[%s3224_s6 + $0x18] sm:$0xff]  ;;  %v896_v22 = vld [vmem:[%s3224_s6 + $0x48] sm:$0xff] }
 0x109   : > { %v826_v26 = vpop.f32.mrf.mxu0 }
 0x10a   : > { %v827_v40 = vadd.f32 %v826_v26, %v694_v25  ;;  %v850_v49 = vmax.f32 %v832_v33, 0.0  ;;  %v881_v11 = vmul.f32 %v873_v4, %v847_v3  ;;  %v899_v25 = vld [vmem:[%s3224_s6 + $0x60] sm:$0xff]  ;;  %v900_v26 = vld [vmem:[%s3224_s6 + $0x68] sm:$0xff] }
 0x10b   : > { %v2216_v32 = vpop.f32.mrf.mxu0  ;;  %v907_v33 = vld [vmem:[%s3224_s6 + $0xa0] sm:$0xff] }
 0x10c   : > { %v842_v34 = vadd.f32 %v2216_v32, %v709_v13  ;;  %v849_v55 = vmax.f32 %v827_v40, 0.0  ;;  %v884_v63 = vmul.f32 %v876_v47, %v850_v49  ;;  %v879_v13 = vmul.f32 %v871_v10, %v845_v9  ;;  %v906_v32 = vld [vmem:[%s3224_s6 + $0x98] sm:$0xff]  ;;  %v2876_v47 = vpop.permute.xlu1 %1028  ;;  %v2880_v49 = vpop.permute.xlu0 %1103 }
 0x10d   : > { %v836_v39 = vpop.f32.mrf.mxu0  ;;  %v914_v40 = vld [vmem:[%s3224_s6 + $0xd8] sm:$0xff] }
 0x10e   : > { %v852_v41 = vmax.f32 %v842_v34, 0.0  ;;  %v837_v42 = vadd.f32 %v836_v39, %v704_v21  ;;  %v883_v5 = vmul.f32 %v875_v56, %v849_v55  ;;  %v895_v21 = vld [vmem:[%s3224_s6 + $0x40] sm:$0xff]  ;;  %v908_v34 = vld [vmem:[%s3224_s6 + $0xa8] sm:$0xff]  ;;  %v913_v39 = vld [vmem:[%s3224_s6 + $0xd0] sm:$0xff] }
 0x110   : > { %v851_v50 = vmax.f32 %v837_v42, 0.0  ;;  %v886_v51 = vmul.f32 %v878_v35, %v852_v41  ;;  %v909_v35 = vld [vmem:[%s3224_s6 + $0xb0] sm:$0xff]  ;;  %v915_v41 = vld [vmem:[%s3224_s6 + $0xe0] sm:$0xff]  ;;  %v916_v42 = vld [vmem:[%s3224_s6 + $0xe8] sm:$0xff]  ;;  %v2890_v54 = vpop.permute.xlu0 %1098 }
 0x112   : > { %v885_v57 = vmul.f32 %v877_v43, %v851_v50  ;;  %2217 = vmatprep.subr.mxu1 %v886_v51  ;;  %v917_v43 = vld [vmem:[%s3224_s6 + $0xf0] sm:$0xff] }
 0x113   : > { %2218 = vmatpush3.msra.mxu1 %v886_v51  ;;  %v2884_v51 = vpop.permute.xlu1 %1023 }
 0x114   : > { %2219 = vmatprep.subr.mxu1 %v885_v57  ;;  %v2900_v59 = vpop.permute.xlu0 %1093 }
 0x115   : > { %2220 = vmatpush3.msra.mxu1 %v885_v57 }
 0x116   : > { %2221 = vmatprep.subr.mxu1 %v884_v63 }
 0x117   : > { %2222 = vmatpush3.msra.mxu1 %v884_v63  ;;  %v2894_v56 = vpop.permute.xlu1 %1018 }
 0x118   : > { %2223 = vmatprep.subr.mxu1 %v883_v5  ;;  %v2910_v0 = vpop.permute.xlu0 %1088 }
 0x119   : > { %2224 = vmatpush3.msra.mxu1 %v883_v5 }
 0x11a   : > { %2225 = vmatprep.subr.mxu1 %v882_v8 }
 0x11b   : > { %2226 = vmatpush3.msra.mxu1 %v882_v8  ;;  %v2904_v61 = vpop.permute.xlu1 %1013 }
 0x11c   : > { %2227 = vmatprep.subr.mxu1 %v881_v11  ;;  %v2920_v5 = vpop.permute.xlu0 %1083 }
 0x11d   : > { %2228 = vmatpush3.msra.mxu1 %v881_v11 }
 0x11e   : > { %2229 = vmatprep.subr.mxu1 %v880_v12 }
 0x11f   : > { %2230 = vmatpush3.msra.mxu1 %v880_v12  ;;  %v2914_v2 = vpop.permute.xlu1 %1008 }
 0x120   : > { %2231 = vmatprep.subr.mxu1 %v879_v13  ;;  %v2930_v10 = vpop.permute.xlu0 %1078 }
 0x121   : > { %2232 = vmatpush3.msra.mxu1 %v879_v13 }
 0x122   : > { %2234 = vmatmul.mubr.msk.f32.vlgmr.msra.gmra.mxu1 %vm1111_vm2, %v888_v14 }
 0x123   : > { %2236 = vmatprep.mubr.msk.f32.mxu1 %vm1111_vm2, %v889_v15  ;;  %v2924_v7 = vpop.permute.xlu1 %1003 }
 0x124   : > { %v2941_v15 = vpop.permute.xlu0 %1073 }
 0x126   : > { %2237 = vmatmul.mubr.msk.f32.gmra.mxu1 %vm1111_vm2, %v890_v16 }
 0x127   : > { %2239 = vmatprep.mubr.msk.f32.mxu1 %vm1111_vm2, %v891_v17  ;;  %v2934_v12 = vpop.permute.xlu1 %998 }
 0x12a   : > { %2240 = vmatmul.mubr.msk.f32.gmra.mxu1 %vm1111_vm2, %v892_v18 }
 0x12b   : > { %2242 = vmatprep.mubr.msk.f32.mxu1 %vm1111_vm2, %v893_v19  ;;  %v2945_v17 = vpop.permute.xlu1 %993  ;;  %v1465_v19 = vld [vmem:[%s2949_s13] sm:$0xff] }
 0x12e   : > { %2243 = vmatmul.mubr.msk.f32.gmra.mxu1 %vm1111_vm2, %v894_v20  ;;  %v1466_v20 = vld [vmem:[%s2949_s13 + $0x8] sm:$0xff] }
 0x12f   : > { %2245 = vmatprep.mubr.msk.f32.mxu1 %vm1111_vm2, %v895_v21 }
 0x132   : > { %2246 = vmatmul.mubr.msk.f32.gmra.mxu1 %vm1111_vm2, %v896_v22  ;;  %v1467_v22 = vld [vmem:[%s2949_s13 + $0x10] sm:$0xff] }
 0x133   : > { %2248 = vmatprep.mubr.msk.f32.mxu1 %vm1111_vm2, %v897_v23  ;;  %v2956_v23 = vpop.permute.xlu0 %1068 }
 0x136   : > { %2249 = vmatmul.mubr.msk.f32.gmra.mxu1 %vm1111_vm2, %v898_v24  ;;  %v1476_v24 = vunpack.c.3.s8 %v1465_v19 }
 0x137   : > { %2251 = vmatprep.mubr.msk.f32.mxu1 %vm1111_vm2, %v899_v25  ;;  %v1468_v25 = vld [vmem:[%s2949_s13 + $0x18] sm:$0xff] }
 0x13a   : > { %2252 = vmatmul.mubr.msk.f32.gmra.mxu1 %vm1111_vm2, %v900_v26 }
 0x13b   : > { %2254 = vmatprep.mubr.msk.f32.mxu1 %vm1111_vm2, %v901_v27  ;;  %v2961_v27 = vpop.permute.xlu1 %988 }
 0x13e   : > { %2255 = vmatmul.mubr.msk.f32.gmra.mxu1 %vm1111_vm2, %v902_v28  ;;  %v1474_v28 = vunpack.c.1.s8 %v1465_v19 }
 0x13f   : > { %2257 = vmatprep.mubr.msk.f32.mxu1 %vm1111_vm2, %v903_v29  ;;  %v1478_v29 = vunpack.c.1.s8 %v1466_v20 }
 0x140   : > { %v2967_v45 = vcvt.s32.f32 %v1474_v28 }
 0x142   : > { %2258 = vmatmul.mubr.msk.f32.gmra.mxu1 %vm1111_vm2, %v904_v30  ;;  %v1477_v30 = vunpack.c.0.s8 %v1466_v20  ;;  %3253 = vst [vmem:[#allocation24_spill] sm:$0xff] %v2967_v45 }
 0x143   : > { %2260 = vmatprep.mubr.msk.f32.mxu1 %vm1111_vm2, %v905_v31  ;;  %v1480_v31 = vunpack.c.3.s8 %v1466_v20 }
 0x146   : > { %2261 = vmatmul.mubr.msk.f32.gmra.mxu1 %vm1111_vm2, %v906_v32  ;;  %v1479_v32 = vunpack.c.2.s8 %v1466_v20  ;;  %v2969_v20 = vpop.permute.xlu0 %1063 }
 0x147   : > { %2263 = vmatprep.mubr.msk.f32.mxu1 %vm1111_vm2, %v907_v33  ;;  %v1482_v33 = vunpack.c.1.s8 %v1467_v22 }
 0x14a   : > { %2264 = vmatmul.mubr.msk.f32.gmra.mxu1 %vm1111_vm2, %v908_v34  ;;  %v1481_v34 = vunpack.c.0.s8 %v1467_v22 }
 0x14b   : > { %2266 = vmatprep.mubr.msk.f32.mxu1 %vm1111_vm2, %v909_v35 }
 0x14e   : > { %2267 = vmatmul.mubr.msk.f32.gmra.mxu1 %vm1111_vm2, %v910_v36  ;;  %v1473_v36 = vunpack.c.0.s8 %v1465_v19 }
 0x14f   : > { %2269 = vmatprep.mubr.msk.f32.mxu1 %vm1111_vm2, %v911_v37  ;;  %v1484_v37 = vunpack.c.3.s8 %v1467_v22 }
 0x152   : > { %2270 = vmatmul.mubr.msk.f32.gmra.mxu1 %vm1111_vm2, %v912_v38  ;;  %v1483_v38 = vunpack.c.2.s8 %v1467_v22 }
 0x153   : > { %2272 = vmatprep.mubr.msk.f32.mxu1 %vm1111_vm2, %v913_v39  ;;  %v1486_v39 = vunpack.c.1.s8 %v1468_v25 }
 0x154   : > { %v1515_v28 = vcvt.s32.f32 %v1483_v38 }
 0x155   : > { %v1518_v45 = vcvt.s32.f32 %v1486_v39 }
 0x156   : > { %2273 = vmatmul.mubr.msk.f32.gmra.mxu1 %vm1111_vm2, %v914_v40  ;;  %v1508_v40 = vcvt.s32.f32 %v1476_v24  ;;  %v2975_v24 = vcvt.s32.f32 %v1473_v36 }
 0x157   : > { %2275 = vmatprep.mubr.msk.f32.mxu1 %vm1111_vm2, %v915_v41  ;;  %v1475_v41 = vunpack.c.2.s8 %v1465_v19  ;;  %v2973_v19 = vpop.permute.xlu1 %983 }
 0x158   : > { %3254 = vst [vmem:[#allocation25_spill] sm:$0xff] %v2975_v24  ;;  %v3006_v24 = vpop.permute.xlu0 %1058 }
 0x159   : > { %3264 = vst [vmem:[#allocation35_spill] sm:$0xff] %v3006_v24 }
 0x15a   : > { %2276 = vmatmul.mubr.msk.f32.gmra.mxu1 %vm1111_vm2, %v916_v42  ;;  %v1485_v42 = vunpack.c.0.s8 %v1468_v25 }
 0x15b   : > { %2278 = vmatprep.mubr.msk.f32.mxu1 %vm1111_vm2, %v917_v43  ;;  %v1488_v43 = vunpack.c.3.s8 %v1468_v25 }
 0x15e   : > { %2279 = vmatmul.mubr.msk.f32.gmra.mxu1 %vm1111_vm2, %v918_v44 }
 0x1e2   : > { %v2878_v48 = vpop.f32.mrf.mxu1 }
 0x1e3   : > { %3241 = vst [vmem:[#allocation12_spill] sm:$0xff] %v2878_v48  ;;  %v1487_v48 = vunpack.c.2.s8 %v1468_v25  ;;  %v2979_v25 = vcvt.s32.f32 %v1475_v41 }
 0x1e4   : > { %v2882_v50 = vpop.f32.mrf.mxu1 }
 0x1e5   : > { %3242 = vst [vmem:[#allocation13_spill] sm:$0xff] %v2882_v50  ;;  %v1510_v50 = vcvt.s32.f32 %v1478_v29  ;;  %v2977_v29 = vmul.f32 1.25, %v1508_v40  ;;  %3256 = vst [vmem:[#allocation27_spill] sm:$0xff] %v2979_v25  ;;  %v3016_v25 = vld [vmem:[%s2949_s13 + $0x30] sm:$0xff] }
 0x1e6   : > { %v2886_v52 = vpop.f32.mrf.mxu1 }
 0x1e7   : > { %3243 = vst [vmem:[#allocation14_spill] sm:$0xff] %v2886_v52  ;;  %v1513_v52 = vcvt.s32.f32 %v1481_v34  ;;  %3255 = vst [vmem:[#allocation26_spill] sm:$0xff] %v2977_v29 }
 0x1e8   : > { %v2888_v53 = vpop.f32.mrf.mxu1 }
 0x1e9   : > { %3244 = vst [vmem:[#allocation15_spill] sm:$0xff] %v2888_v53  ;;  %v1511_v53 = vcvt.s32.f32 %v1479_v32  ;;  %v1472_v32 = vld [vmem:[%s2949_s13 + $0x38] sm:$0xff]  ;;  %v2995_v40 = vmul.f32 1.25, %v1513_v52 }
 0x1ea   : > { %v2892_v55 = vpop.f32.mrf.mxu1  ;;  %v1504_v36 = vunpack.c.3.s8 %v1472_v32  ;;  %v1502_v29 = vunpack.c.1.s8 %v1472_v32 }
 0x1eb   : > { %3245 = vst [vmem:[#allocation16_spill] sm:$0xff] %v2892_v55  ;;  %v2987_v55 = vld [vmem:[%s2949_s13 + $0x20] sm:$0xff]  ;;  %v2991_v38 = vmul.f32 1.25, %v1511_v53  ;;  %3263 = vst [vmem:[#allocation34_spill] sm:$0xff] %v2995_v40 }
 0x1ec   : > { %v2896_v57 = vpop.f32.mrf.mxu1  ;;  %3259 = vst [vmem:[#allocation30_spill] sm:$0xff] %v2987_v55 }
 0x1ed   : > { %3246 = vst [vmem:[#allocation17_spill] sm:$0xff] %v2896_v57  ;;  %v1520_v57 = vcvt.s32.f32 %v1488_v43  ;;  %3261 = vst [vmem:[#allocation32_spill] sm:$0xff] %v2991_v38  ;;  %v1503_v43 = vunpack.c.2.s8 %v1472_v32 }
 0x1ee   : > { %v2898_v58 = vpop.f32.mrf.mxu1 }
 0x1ef   : > { %v1552_v53 = vmul.f32 1.25, %v1520_v57  ;;  %v1497_v57 = vunpack.c.0.s8 %v3016_v25 }
 0x1f0   : > { %v2902_v60 = vpop.f32.mrf.mxu1 }
 0x1f2   : > { %v2906_v62 = vpop.f32.mrf.mxu1 }
 0x1f4   : > { %v2908_v63 = vpop.f32.mrf.mxu1 }
 0x1f6   : > { %v2912_v1 = vpop.f32.mrf.mxu1 }
 0x1f8   : > { %v2916_v3 = vpop.f32.mrf.mxu1 }
 0x1fa   : > { %v2918_v4 = vpop.f32.mrf.mxu1 }
 0x1fc   : > { %v2922_v6 = vpop.f32.mrf.mxu1 }
 0x1fe   : > { %v2926_v8 = vpop.f32.mrf.mxu1 }
 0x1ff   : > { %v1350_v38 = vadd.f32 %v2926_v8, %v2876_v47  ;;  %v1500_v47 = vunpack.c.3.s8 %v3016_v25  ;;  %v1534_v8 = vcvt.s32.f32 %v1502_v29 }
 0x200   : > { %v2928_v9 = vpop.f32.mrf.mxu1 }
 0x202   : > { %v2932_v11 = vpop.f32.mrf.mxu1 }
 0x203   : > { %3247 = vst [vmem:[#allocation18_spill] sm:$0xff] %v2932_v11  ;;  %v1512_v11 = vcvt.s32.f32 %v1480_v31 }
 0x204   : > { %v2936_v13 = vpop.f32.mrf.mxu1 }
 0x205   : > { %3248 = vst [vmem:[#allocation19_spill] sm:$0xff] %v2936_v13  ;;  %v1509_v13 = vcvt.s32.f32 %v1477_v30  ;;  %v1517_v30 = vcvt.s32.f32 %v1485_v42 }
 0x206   : > { %v2939_v14 = vpop.f32.mrf.mxu1 }
 0x207   : > { %3249 = vst [vmem:[#allocation20_spill] sm:$0xff] %v2939_v14  ;;  %v1516_v14 = vcvt.s32.f32 %v1484_v37  ;;  %v2984_v34 = vmul.f32 1.25, %v1509_v13  ;;  %v2989_v37 = vmul.f32 1.25, %v1512_v11  ;;  %v3001_v13 = vmul.f32 1.25, %v1518_v45 }
 0x208   : > { %v2943_v16 = vpop.f32.mrf.mxu1  ;;  %v3008_v11 = vmul.f32 1.25, %v1517_v30  ;;  %v1345_v45 = vadd.f32 %v2928_v9, %v2884_v51  ;;  %v1499_v51 = vunpack.c.2.s8 %v3016_v25 }
 0x209   : > { %3250 = vst [vmem:[#allocation21_spill] sm:$0xff] %v2943_v16  ;;  %v1514_v16 = vcvt.s32.f32 %v1482_v33  ;;  %v2982_v33 = vmul.f32 1.25, %v1510_v50  ;;  %3258 = vst [vmem:[#allocation29_spill] sm:$0xff] %v2984_v34  ;;  %v2997_v42 = vmul.f32 1.25, %v1516_v14  ;;  %v2999_v50 = vmul.f32 1.25, %v1515_v28  ;;  %v3011_v34 = vpop.permute.xlu1 %978 }
 0x20a   : > { %v2947_v18 = vpop.f32.mrf.mxu1  ;;  %3260 = vst [vmem:[#allocation31_spill] sm:$0xff] %v2989_v37  ;;  %3265 = vst [vmem:[#allocation36_spill] sm:$0xff] %v3011_v34  ;;  %v1501_v37 = vunpack.c.0.s8 %v1472_v32  ;;  %v1448_v28 = vmax.f32 %v1350_v38, 0.0  ;;  %v1330_v38 = vadd.f32 %v2912_v1, %v2914_v2 }
 0x20b   : > { %3251 = vst [vmem:[#allocation22_spill] sm:$0xff] %v2947_v18  ;;  %3257 = vst [vmem:[#allocation28_spill] sm:$0xff] %v2982_v33  ;;  %v2993_v39 = vmul.f32 1.25, %v1514_v16  ;;  %v1536_v33 = vcvt.s32.f32 %v1504_v36  ;;  %v1498_v36 = vunpack.c.1.s8 %v3016_v25 }
 0x20c   : > { %v2953_v21 = vpop.f32.mrf.mxu1  ;;  %v1533_v9 = vcvt.s32.f32 %v1501_v37 }
 0x20d   : > { %3252 = vst [vmem:[#allocation23_spill] sm:$0xff] %v2953_v21  ;;  %v1519_v21 = vcvt.s32.f32 %v1487_v48  ;;  %3262 = vst [vmem:[#allocation33_spill] sm:$0xff] %v2993_v39  ;;  %v3004_v48 = vld [vmem:[%s2949_s13 + $0x28] sm:$0xff]  ;;  %v1535_v39 = vcvt.s32.f32 %v1503_v43  ;;  %v1568_v55 = vmul.f32 1.25, %v1536_v33  ;;  %v1340_v43 = vadd.f32 %v2918_v4, %v2894_v56  ;;  %v3037_v18 = vpop.permute.xlu1 %973  ;;  %s3303_s13 = sadd.s32 4294967295, %s2404_s26  }
 0x20e   : > { %v2959_v26 = vpop.f32.mrf.mxu1  ;;  %3267 = vst [vmem:[#allocation38_spill] sm:$0xff] %v3037_v18  ;;  %v1447_v33 = vmax.f32 %v1345_v45, 0.0  ;;  %s2083_s17 = sshll.u32 %s3303_s13, 4 }
 0x20f   : > { %v1551_v14 = vmul.f32 1.25, %v1519_v21  ;;  %v3032_v21 = vpop.permute.xlu0 %1053  ;;  %v1446_v18 = vmax.f32 %v1340_v43, 0.0  ;;  %s3182_s14 = scalar_lea.hbm %s3230_s12, %s2083_s17 }
 0x210   : > { %v2963_v35 = vpop.f32.mrf.mxu1  ;;  %3266 = vst [vmem:[#allocation37_spill] sm:$0xff] %v3032_v21  ;;  %v1566_v21 = vmul.f32 1.25, %v1534_v8  ;;  %v1310_v8 = vadd.f32 %v2898_v58, %v2961_v27  ;;  %v3270_v27 = vunpack.c.1.s8 %v3004_v48 }
 0x211   : > { %v1582_v45 = vmul.f32 %v3001_v13, %v1446_v18  ;;  %v1390_v18 = vadd.f32 %v2959_v26, %v2956_v23 }
 0x212   : > { %v2965_v44 = vpop.f32.mrf.mxu1 }
 0x213   : > { %v1400_v1 = vadd.f32 %v2965_v44, %v2930_v10  ;;  %v1315_v10 = vadd.f32 %v2908_v63, %v2945_v17  ;;  %v3269_v17 = vunpack.c.2.s8 %v3004_v48 }
 0x214   : > { %v2971_v22 = vpop.f32.mrf.mxu1 }
 0x215   : > { %v1458_v13 = vmax.f32 %v1400_v1, 0.0 }
 0x216   : > { %v2274_v31 = vpop.f32.mrf.mxu1 }
 0x217   : > { %v1410_v56 = vadd.f32 %v2274_v31, %v2910_v0  ;;  %v1325_v0 = vadd.f32 %v2916_v3, %v2924_v7  ;;  %v3051_v31 = vpop.permute.xlu1 %968  ;;  %v1529_v3 = vcvt.s32.f32 %v1497_v57  ;;  %v1395_v7 = vadd.f32 %v2971_v22, %v2941_v15 }
 0x218   : > { %v1404_v41 = vpop.f32.mrf.mxu1 }
 0x219   : > { %v1460_v2 = vmax.f32 %v1410_v56, 0.0  ;;  %v1443_v44 = vmax.f32 %v1325_v0, 0.0  ;;  %v1457_v23 = vmax.f32 %v1395_v7, 0.0  ;;  %v1561_v26 = vmul.f32 1.25, %v1529_v3 }
 0x21a   : > { %v2277_v52 = vpop.f32.mrf.mxu1 }
 0x21b   : > { %v1420_v32 = vadd.f32 %v2277_v52, %v2890_v54  ;;  %v1567_v52 = vmul.f32 1.25, %v1535_v39  ;;  %v1565_v39 = vmul.f32 1.25, %v1533_v9  ;;  %v964_v43 = vpop.permute.xlu1 %963  ;;  %v1579_v58 = vmul.f32 %v2999_v50, %v1443_v44 }
 0x21c   : > { %v1414_v16 = vpop.f32.mrf.mxu1 }
 0x21d   : > { %v1415_v29 = vadd.f32 %v1414_v16, %v2900_v59  ;;  %v1462_v4 = vmax.f32 %v1420_v32, 0.0  ;;  %v1584_v59 = vmul.f32 %v1552_v53, %v1448_v28  ;;  %v1320_v53 = vadd.f32 %v2906_v62, %v2934_v12 }
 0x21e   : > { %v2280_v30 = vpop.f32.mrf.mxu1  ;;  %v1444_v28 = vmax.f32 %v1330_v38, 0.0  ;;  %v3268_v62 = vunpack.c.3.s8 %v3004_v48  ;;  %v3275_v38 = vld [vmem:[#allocation33_spill] sm:$0xff] }
 0x21f   : > { %v1430_v40 = vadd.f32 %v2280_v30, %v2874_v46  ;;  %v1335_v46 = vadd.f32 %v2922_v6, %v2904_v61  ;;  %v1532_v30 = vcvt.s32.f32 %v1500_v47  ;;  %v3047_v61 = vpop.permute.xlu0 %1048  ;;  %v1442_v32 = vmax.f32 %v1320_v53, 0.0 }
 0x220   : > { %v1424_v34 = vpop.f32.mrf.mxu1  ;;  %v1528_v12 = vcvt.s32.f32 %v3268_v62  ;;  %v1580_v63 = vmul.f32 %v2997_v42, %v1444_v28  ;;  %v1526_v42 = vcvt.s32.f32 %v3270_v27  ;;  %v3293_v27 = vld [vmem:[#allocation12_spill] sm:$0xff] }
 0x221   : > { %v1464_v24 = vmax.f32 %v1430_v40, 0.0  ;;  %v1425_v54 = vadd.f32 %v1424_v34, %v2880_v49  ;;  %v1531_v40 = vcvt.s32.f32 %v1499_v51  ;;  %v1405_v49 = vadd.f32 %v1404_v41, %v2920_v5 }
 0x222   : > { %v1461_v34 = vmax.f32 %v1415_v29, 0.0  ;;  %v1445_v6 = vmax.f32 %v1335_v46, 0.0  ;;  %v1564_v5 = vmul.f32 1.25, %v1532_v30  ;;  %v1598_v41 = vmul.f32 %v1566_v21, %v1462_v4  ;;  %v3272_v46 = vld [vmem:[#allocation22_spill] sm:$0xff]  ;;  %v3274_v4 = vld [vmem:[#allocation16_spill] sm:$0xff] }
 0x223   : > { %v1600_v25 = vmul.f32 %v1568_v55, %v1464_v24  ;;  %v1463_v37 = vmax.f32 %v1425_v54, 0.0  ;;  %v1583_v55 = vmul.f32 %v1551_v14, %v1447_v33  ;;  %v1530_v24 = vcvt.s32.f32 %v1498_v36  ;;  %v1044_v22 = vpop.permute.xlu0 %1043 }
 0x224   : > { %v1459_v14 = vmax.f32 %v1405_v49, 0.0  ;;  %v1563_v36 = vmul.f32 1.25, %v1531_v40  ;;  %v1597_v47 = vmul.f32 %v1565_v39, %v1461_v34  ;;  %v1581_v21 = vmul.f32 %v3008_v11, %v1445_v6  ;;  %v3278_v40 = vld [vmem:[#allocation23_spill] sm:$0xff]  ;;  %v3279_v6 = vld [vmem:[#allocation38_spill] sm:$0xff] }
 0x225   : > { %v1599_v16 = vmul.f32 %v1567_v52, %v1463_v37  ;;  %2136 = vmatprep.subr.mxu0 %v1600_v25  ;;  %v1562_v57 = vmul.f32 1.25, %v1530_v24  ;;  %v1596_v15 = vmul.f32 %v1564_v5, %v1460_v2  ;;  %v1527_v11 = vcvt.s32.f32 %v3269_v17  ;;  %v3271_v52 = vld [vmem:[#allocation35_spill] sm:$0xff]  ;;  %v3281_v2 = vld [vmem:[#allocation34_spill] sm:$0xff] }
 0x226   : > { %2137 = vmatpush3.msra.mxu0 %v1584_v59  ;;  %v1385_v51 = vadd.f32 %v2963_v35, %v2969_v20  ;;  %v1595_v9 = vmul.f32 %v1563_v36, %v1459_v14  ;;  %v1305_v29 = vadd.f32 %v2902_v60, %v2973_v19  ;;  %v1441_v54 = vmax.f32 %v1315_v10, 0.0  ;;  %v3273_v20 = vld [vmem:[#allocation36_spill] sm:$0xff]  ;;  %v3277_v59 = vld [vmem:[#allocation37_spill] sm:$0xff] }
 0x227   : > { %2138 = vmatprep.subr.mxu0 %v1599_v16  ;;  %v1380_v33 = vadd.f32 %v3272_v46, %v3271_v52  ;;  %v1456_v30 = vmax.f32 %v1390_v18, 0.0  ;;  %v1560_v56 = vmul.f32 1.25, %v1528_v12  ;;  %v1594_v35 = vmul.f32 %v1562_v57, %v1458_v13  ;;  %v1039_v0 = vpop.permute.xlu0 %1038  ;;  %v3288_v13 = vld [vmem:[#allocation21_spill] sm:$0xff]  ;;  %v3294_v46 = vld [vmem:[#allocation28_spill] sm:$0xff] }
 0x228   : > { %2139 = vmatpush3.msra.mxu0 %v1583_v55  ;;  %v1300_v25 = vadd.f32 %v3274_v4, %v3273_v20  ;;  %v1440_v37 = vmax.f32 %v1310_v8, 0.0  ;;  %v1578_v60 = vmul.f32 %v3275_v38, %v1442_v32  ;;  %v3276_v19 = vunpack.c.0.s8 %v3004_v48  ;;  %v3280_v55 = vld [vmem:[#allocation17_spill] sm:$0xff]  ;;  %v959_v48 = vpop.permute.xlu1 %958 }
 0x229   : > { %2140 = vmatprep.subr.mxu0 %v1598_v41  ;;  %v1375_v49 = vadd.f32 %v3278_v40, %v3277_v59  ;;  %v1455_v34 = vmax.f32 %v1385_v51, 0.0  ;;  %v1559_v39 = vmul.f32 1.25, %v1527_v11  ;;  %v1593_v16 = vmul.f32 %v1561_v26, %v1457_v23  ;;  %v3282_v41 = vld [vmem:[#allocation30_spill] sm:$0xff]  ;;  %v3290_v11 = vld [vmem:[#allocation32_spill] sm:$0xff]  ;;  %v3297_v38 = vld [vmem:[#allocation13_spill] sm:$0xff] }
 0x22a   : > { %2141 = vmatpush3.msra.mxu0 %v1582_v45  ;;  %v1525_v50 = vcvt.s32.f32 %v3276_v19  ;;  %v1295_v24 = vadd.f32 %v3280_v55, %v3279_v6  ;;  %v1439_v1 = vmax.f32 %v1305_v29, 0.0  ;;  %v1577_v5 = vmul.f32 %v3281_v2, %v1441_v54  ;;  %v3284_v45 = vld [vmem:[#allocation20_spill] sm:$0xff]  ;;  %v3292_v26 = vld [vmem:[#allocation18_spill] sm:$0xff]  ;;  %v3299_v40 = vld [vmem:[#allocation29_spill] sm:$0xff] }
 0x22b   : > { %2142 = vmatprep.subr.mxu0 %v1597_v47  ;;  %v3283_v53 = vunpack.c.3.s8 %v3282_v41  ;;  %v1370_v3 = vadd.f32 %v3284_v45, %v3047_v61  ;;  %v1454_v7 = vmax.f32 %v1380_v33, 0.0  ;;  %v1558_v14 = vmul.f32 1.25, %v1526_v42  ;;  %v3285_v47 = vld [vmem:[#allocation14_spill] sm:$0xff]  ;;  %v3289_v61 = vld [vmem:[#allocation15_spill] sm:$0xff]  ;;  %v3300_v6 = vld [vmem:[#allocation24_spill] sm:$0xff] }
 0x22c   : > { %2143 = vmatpush3.msra.mxu0 %v1581_v21  ;;  %v1592_v36 = vmul.f32 %v1560_v56, %v1456_v30  ;;  %v1290_v10 = vadd.f32 %v3285_v47, %v3051_v31  ;;  %v1438_v44 = vmax.f32 %v1300_v25, 0.0  ;;  %v3286_v21 = vld [vmem:[#allocation31_spill] sm:$0xff]  ;;  %v3287_v12 = vunpack.c.2.s8 %v3282_v41  ;;  %v954_v56 = vpop.permute.xlu1 %953 }
 0x22d   : > { %2144 = vmatprep.subr.mxu0 %v1596_v15  ;;  %v1524_v28 = vcvt.s32.f32 %v3283_v53  ;;  %v1576_v62 = vmul.f32 %v3286_v21, %v1440_v37  ;;  %v1365_v57 = vadd.f32 %v3288_v13, %v1044_v22  ;;  %v1453_v15 = vmax.f32 %v1375_v49, 0.0  ;;  %v1034_v22 = vpop.permute.xlu0 %1033  ;;  %v1601_v47 = vld [vmem:[%s3226_s8] sm:$0xff]  ;;  %v1606_v21 = vld [vmem:[%s3226_s8 + $0x28] sm:$0xff] }
 0x22e   : > { %2145 = vmatpush3.msra.mxu0 %v1580_v63  ;;  %v1523_v18 = vcvt.s32.f32 %v3287_v12  ;;  %v1557_v8 = vmul.f32 1.25, %v1525_v50  ;;  %v1591_v32 = vmul.f32 %v1559_v39, %v1455_v34  ;;  %v1285_v63 = vadd.f32 %v3289_v61, %v964_v43  ;;  %v3298_v50 = vld [vmem:[#allocation27_spill] sm:$0xff]  ;;  %v1610_v13 = vld [vmem:[%s3226_s8 + $0x48] sm:$0xff] }
 0x22f   : > { %2146 = vmatprep.subr.mxu0 %v1595_v9  ;;  %v1437_v17 = vmax.f32 %v1295_v24, 0.0  ;;  %v1575_v51 = vmul.f32 %v3290_v11, %v1439_v1  ;;  %v3291_v31 = vunpack.c.1.s8 %v3282_v41  ;;  %v1360_v9 = vadd.f32 %v3292_v26, %v1039_v0  ;;  %v3301_v24 = vld [vmem:[#allocation26_spill] sm:$0xff]  ;;  %v1613_v61 = vld [vmem:[%s3226_s8 + $0x60] sm:$0xff] }
 0x230   : > { %2147 = vmatpush3.msra.mxu0 %v1579_v58  ;;  %v1452_v29 = vmax.f32 %v1370_v3, 0.0  ;;  %v1556_v54 = vmul.f32 1.25, %v1524_v28  ;;  %v1590_v58 = vmul.f32 %v1558_v14, %v1454_v7  ;;  %v1280_v42 = vadd.f32 %v3293_v27, %v959_v48  ;;  %v3302_v28 = vld [vmem:[#allocation25_spill] sm:$0xff]  ;;  %v1608_v12 = vld [vmem:[%s3226_s8 + $0x38] sm:$0xff] }
 0x231   : > { %2148 = vmatprep.subr.mxu0 %v1594_v35  ;;  %v1522_v23 = vcvt.s32.f32 %v3291_v31  ;;  %v1436_v52 = vmax.f32 %v1290_v10, 0.0  ;;  %v1574_v33 = vmul.f32 %v3294_v46, %v1438_v44  ;;  %v3295_v43 = vunpack.c.0.s8 %v3282_v41  ;;  %v3296_v35 = vld [vmem:[#allocation19_spill] sm:$0xff]  ;;  %v1603_v44 = vld [vmem:[%s3226_s8 + $0x10] sm:$0xff] }
 0x232   : > { %2149 = vmatpush3.msra.mxu0 %v1578_v60  ;;  %v1355_v20 = vadd.f32 %v3296_v35, %v1034_v22  ;;  %v1451_v4 = vmax.f32 %v1365_v57, 0.0  ;;  %v1555_v25 = vmul.f32 1.25, %v1523_v18  ;;  %v1589_v37 = vmul.f32 %v1557_v8, %v1453_v15  ;;  %v1604_v10 = vld [vmem:[%s3226_s8 + $0x18] sm:$0xff]  ;;  %v1607_v18 = vld [vmem:[%s3226_s8 + $0x30] sm:$0xff]  ;;  %v1609_v57 = vld [vmem:[%s3226_s8 + $0x40] sm:$0xff] }
 0x233   : > { %2150 = vmatprep.subr.mxu0 %v1593_v16  ;;  %v1521_v30 = vcvt.s32.f32 %v3295_v43  ;;  %v1275_v60 = vadd.f32 %v3297_v38, %v954_v56  ;;  %v1435_v19 = vmax.f32 %v1285_v63, 0.0  ;;  %v1539_v59 = vmul.f32 1.25, %v3298_v50  ;;  %v1612_v15 = vld [vmem:[%s3226_s8 + $0x58] sm:$0xff]  ;;  %v1611_v8 = vld [vmem:[%s3226_s8 + $0x50] sm:$0xff]  ;;  %v1658_v43 = vpop.permute.xlu1 %1657 }
 0x234   : > { %2151 = vmatpush3.msra.mxu0 %v1577_v5  ;;  %v1573_v49 = vmul.f32 %v3299_v40, %v1437_v17  ;;  %v1450_v34 = vmax.f32 %v1360_v9, 0.0  ;;  %v1554_v39 = vmul.f32 1.25, %v1522_v23  ;;  %v1588_v16 = vmul.f32 %v1556_v54, %v1452_v29  ;;  %v1616_v63 = vld [vmem:[%s3226_s8 + $0x78] sm:$0xff]  ;;  %v1615_v17 = vld [vmem:[%s3226_s8 + $0x70] sm:$0xff] }
 0x235   : > { %2152 = vmatprep.subr.mxu0 %v1592_v36  ;;  %v1434_v0 = vmax.f32 %v1280_v42, 0.0  ;;  %v1538_v55 = vmul.f32 1.25, %v3300_v6  ;;  %v1572_v1 = vmul.f32 %v3301_v24, %v1436_v52  ;;  %v1449_v2 = vmax.f32 %v1355_v20, 0.0  ;;  %v1663_v52 = vpop.permute.xlu0 %1662 }
 0x236   : > { %2153 = vmatpush3.msra.mxu0 %v1576_v62  ;;  %v1553_v5 = vmul.f32 1.25, %v1521_v30  ;;  %v1587_v41 = vmul.f32 %v1555_v25, %v1451_v4  ;;  %v1433_v53 = vmax.f32 %v1275_v60, 0.0  ;;  %v1537_v48 = vmul.f32 1.25, %v3302_v28  ;;  %v1605_v62 = vld [vmem:[%s3226_s8 + $0x20] sm:$0xff] }
 0x237   : > { %2154 = vmatprep.subr.mxu0 %v1591_v32  ;;  %v1571_v45 = vmul.f32 %v1539_v59, %v1435_v19  ;;  %v1586_v3 = vmul.f32 %v1554_v39, %v1450_v34  ;;  %v1570_v7 = vmul.f32 %v1538_v55, %v1434_v0  ;;  %v1614_v32 = vld [vmem:[%s3226_s8 + $0x68] sm:$0xff]  ;;  %v2407_v11 = vmov 0.0   ;;  %v1648_v50 = vpop.permute.xlu1 %1647 }
 0x238   : > { %2155 = vmatpush3.msra.mxu0 %v1575_v51  ;;  %v1585_v14 = vmul.f32 %v1553_v5, %v1449_v2  ;;  %v1569_v36 = vmul.f32 %v1537_v48, %v1433_v53  ;;  %v1778_v34 = vld [vmem:[%s603_s27] sm:$0xff] }
 0x239   : > { %2156 = vmatprep.subr.mxu0 %v1590_v58  ;;  %v1653_v25 = vpop.permute.xlu0 %1652  ;;  %v1783_v6 = vunpack.c.3.s8 %v1778_v34  ;;  %v1782_v53 = vunpack.c.2.s8 %v1778_v34 }
 0x23a   : > { %2157 = vmatpush3.msra.mxu0 %v1574_v33  ;;  %v1779_v33 = vld [vmem:[%s603_s27 + $0x8] sm:$0xff]  ;;  %s2409_s27 = smov [#allocation7]  }
 0x23b   : > { %2158 = vmatprep.subr.mxu0 %v1589_v37  ;;  %v1787_v56 = vunpack.c.3.s8 %v1779_v33  ;;  %v1786_v20 = vunpack.c.2.s8 %v1779_v33  ;;  %v1785_v37 = vunpack.c.1.s8 %v1779_v33  ;;  %v1784_v59 = vunpack.c.0.s8 %v1779_v33  ;;  %s2348_s28 = sshll.u32 %s2409_s27, 4  ;;  %s2349_s28 = int_to_ptr.vmem [resolvable:$false] %s2348_s28 }
 0x23c   : > { %2159 = vmatpush3.msra.mxu0 %v1573_v49  ;;  %s2350_s11 = scalar_lea.vmem %s2349_s28, 32  ;;  %p2351_p2 = scmp.lt.s32.totalorder %s1911_s30, %s2349_s28 }
 0x23d   : > { %2160 = vmatprep.subr.mxu0 %v1588_v16  ;;  %v1795_v19 = vcvt.s32.f32 %v1787_v56  ;;  %v1794_v40 = vcvt.s32.f32 %v1786_v20  ;;  %v1793_v55 = vcvt.s32.f32 %v1785_v37  ;;  %v1792_v28 = vcvt.s32.f32 %v1784_v59  ;;  %p2352_p3 = scmp.lt.s32.totalorder %s2350_s11, %s2344_s22 }
 0x23e   : > { %2161 = vmatpush3.msra.mxu0 %v1572_v1 }
 0x23f   : > { %2162 = vmatprep.subr.mxu0 %v1587_v41  ;;  %v1803_v5 = vmul.f32 1.25, %v1795_v19  ;;  %v1643_v41 = vpop.permute.xlu0 %1642  ;;  %v1802_v48 = vmul.f32 1.25, %v1794_v40  ;;  %p2353_p4 = por %p2352_p3, %p2351_p2 }
 0x240   : > { %2163 = vmatpush3.msra.mxu0 %v1571_v45 }
 0x241   : > { %2164 = vmatprep.subr.mxu0 %v1586_v3  ;;  %p2354_p5 = pnand %p2353_p4, %p2347_p1 }
 0x242   : > { %2165 = vmatpush3.msra.mxu0 %v1570_v7 }
 0x243   : > { %2166 = vmatprep.subr.mxu0 %v1585_v14 }
 0x244   : > { %2167 = vmatpush3.msra.mxu0 %v1569_v36  ;;  %v1638_v36 = vpop.permute.xlu1 %1637 }
 0x245   : > { %1730 = vmatmul.mubr.f32.vlgmr.msra.gmra.mxu0 %v1601_v47  ;;  %2281 = vmatprep.subr.mxu0 %v2407_v11  ;;  %v1781_v47 = vunpack.c.1.s8 %v1778_v34 }
 0x246   : > { %1734 = vmatprep.mubr.f32.mxu0 %v1604_v10  ;;  %v1791_v10 = vcvt.s32.f32 %v1783_v6 }
 0x249   : > { %1735 = vmatmul.mubr.f32.gmra.mxu0 %v1603_v44  ;;  %v1801_v44 = vmul.f32 1.25, %v1793_v55 }
 0x24a   : > { %1739 = vmatprep.mubr.f32.mxu0 %v1606_v21 }
 0x24d   : > { %1740 = vmatmul.mubr.f32.gmra.mxu0 %v1605_v62 }
 0x24e   : > { %1744 = vmatprep.mubr.f32.mxu0 %v1608_v12 }
 0x251   : > { %1745 = vmatmul.mubr.f32.gmra.mxu0 %v1607_v18 }
 0x252   : > { %1749 = vmatprep.mubr.f32.mxu0 %v1610_v13  ;;  %v1780_v13 = vunpack.c.0.s8 %v1778_v34 }
 0x255   : > { %1750 = vmatmul.mubr.f32.gmra.mxu0 %v1609_v57  ;;  %v1790_v57 = vcvt.s32.f32 %v1782_v53 }
 0x256   : > { %1754 = vmatprep.mubr.f32.mxu0 %v1612_v15  ;;  %v1800_v15 = vmul.f32 1.25, %v1792_v28 }
 0x259   : > { %1755 = vmatmul.mubr.f32.gmra.mxu0 %v1611_v8 }
 0x25a   : > { %1759 = vmatprep.mubr.f32.mxu0 %v1614_v32 }
 0x25d   : > { %1760 = vmatmul.mubr.f32.gmra.mxu0 %v1613_v61 }
 0x25e   : > { %1764 = vmatprep.mubr.f32.mxu0 %v1616_v63 }
 0x261   : > { %1765 = vmatmul.mubr.f32.gmra.mxu0 %v1615_v17  ;;  %v1633_v17 = vpop.permute.xlu0 %1632 }
 0x262   : > { %2297 = vmatprep.mubr.msk.f32.mxu0 %vm2408_vm3, %v2407_v11 }
 0x305   : > { %v2168_v51 = vpop.f32.mrf.mxu0 }
 0x307   : > { %v2169_v31 = vpop.f32.mrf.mxu0 }
 0x308   : > { %v2170_v8 = vadd.f32 %v2169_v31, %v2168_v51  ;;  %v1798_v51 = vmul.f32 1.25, %v1790_v57 }
 0x309   : > { %v2171_v23 = vpop.f32.mrf.mxu0 }
 0x30b   : > { %v2172_v26 = vpop.f32.mrf.mxu0 }
 0x30c   : > { %v2173_v21 = vadd.f32 %v2172_v26, %v2171_v23  ;;  %v1628_v23 = vpop.permute.xlu1 %1627  ;;  %v1788_v26 = vcvt.s32.f32 %v1780_v13 }
 0x30d   : > { %v2174_v9 = vpop.f32.mrf.mxu0 }
 0x30f   : > { %v2175_v29 = vpop.f32.mrf.mxu0 }
 0x310   : > { %v2176_v45 = vadd.f32 %v2175_v29, %v2174_v9  ;;  %v1789_v9 = vcvt.s32.f32 %v1781_v47  ;;  %v1737_v29 = vadd.f32 %v2173_v21, %v1633_v17 }
 0x311   : > { %v2177_v54 = vpop.f32.mrf.mxu0 }
 0x312   : > { %v1742_v32 = vadd.f32 %v2176_v45, %v1638_v36 }
 0x313   : > { %v2178_v58 = vpop.f32.mrf.mxu0 }
 0x314   : > { %v2179_v24 = vadd.f32 %v2178_v58, %v2177_v54  ;;  %v1799_v58 = vmul.f32 1.25, %v1791_v10 }
 0x315   : > { %v2180_v22 = vpop.f32.mrf.mxu0 }
 0x316   : > { %v1747_v62 = vadd.f32 %v2179_v24, %v1643_v41 }
 0x317   : > { %v2181_v27 = vpop.f32.mrf.mxu0 }
 0x318   : > { %v2182_v39 = vadd.f32 %v2181_v27, %v2180_v22  ;;  %v1773_v54 = vmax.f32 %v1747_v62, 0.0  ;;  %v1732_v27 = vadd.f32 %v2170_v8, %v1628_v23 }
 0x319   : > { %v2183_v42 = vpop.f32.mrf.mxu0 }
 0x31a   : > { %v1752_v3 = vadd.f32 %v2182_v39, %v1648_v50  ;;  %v1807_v33 = vmul.f32 %v1799_v58, %v1773_v54 }
 0x31b   : > { %v2184_v46 = vpop.f32.mrf.mxu0 }
 0x31c   : > { %v2185_v60 = vadd.f32 %v2184_v46, %v2183_v42  ;;  %v1774_v61 = vmax.f32 %v1752_v3, 0.0  ;;  %v1772_v42 = vmax.f32 %v1742_v32, 0.0  ;;  %v1797_v46 = vmul.f32 1.25, %v1789_v9 }
 0x31d   : > { %v2186_v30 = vpop.f32.mrf.mxu0 }
 0x31e   : > { %v1757_v1 = vadd.f32 %v2185_v60, %v1653_v25  ;;  %v1808_v31 = vmul.f32 %v1800_v15, %v1774_v61  ;;  %v1806_v56 = vmul.f32 %v1798_v51, %v1772_v42  ;;  %v1819_v25 = vlaneseq  ;;  %v1817_v60 = vpop.permute.xlu0 %1816 }
 0x31f   : > { %v2187_v35 = vpop.f32.mrf.mxu0 }
 0x320   : > { %v2188_v4 = vadd.f32 %v2187_v35, %v2186_v30  ;;  %v1775_v12 = vmax.f32 %v1757_v1, 0.0  ;;  %v1796_v30 = vmul.f32 1.25, %v1788_v26  ;;  %v1820_v37 = vshrl.u32 %v1819_v25, 7 }
 0x321   : > { %v2189_v38 = vpop.f32.mrf.mxu0 }
 0x322   : > { %v1762_v16 = vadd.f32 %v2188_v4, %v1658_v43  ;;  %v1809_v22 = vmul.f32 %v1801_v44, %v1775_v12  ;;  %v1770_v43 = vmax.f32 %v1732_v27, 0.0  ;;  %v1812_v4 = vld [vmem:[%s3228_s10] sm:$0x1] }
 0x323   : > { %v2190_v49 = vpop.f32.mrf.mxu0 }
 0x324   : > { %v2191_v0 = vadd.f32 %v2190_v49, %v2189_v38  ;;  %v1776_v7 = vmax.f32 %v1762_v16, 0.0  ;;  %v1804_v20 = vmul.f32 %v1796_v30, %v1770_v43  ;;  %v1821_v38 = vsub.s32 0, %v1820_v37 }
 0x326   : > { %v1767_v2 = vadd.f32 %v2191_v0, %v1663_v52  ;;  %v1810_v63 = vmul.f32 %v1802_v48, %v1776_v7  ;;  %v1771_v52 = vmax.f32 %v1737_v29, 0.0  ;;  %v1822_v19 = vrot.slane %v1817_v60, %v1821_v38 }
 0x328   : > { %v1777_v14 = vmax.f32 %v1767_v2, 0.0  ;;  %v1805_v35 = vmul.f32 %v1797_v46, %v1771_v52 }
 0x32a   : > { %v1811_v18 = vmul.f32 %v1803_v5, %v1777_v14 }
 0x32c   : > { %2282 = vmatpush3.msra.mxu0 %v1811_v18 }
 0x32d   : > { %2283 = vmatprep.subr.mxu0 %v2407_v11 }
 0x32e   : > { %2284 = vmatpush3.msra.mxu0 %v1810_v63 }
 0x32f   : > { %2285 = vmatprep.subr.mxu0 %v2407_v11 }
 0x330   : > { %2286 = vmatpush3.msra.mxu0 %v1809_v22 }
 0x331   : > { %2287 = vmatprep.subr.mxu0 %v2407_v11 }
 0x332   : > { %2288 = vmatpush3.msra.mxu0 %v1808_v31 }
 0x333   : > { %2289 = vmatprep.subr.mxu0 %v2407_v11 }
 0x334   : > { %2290 = vmatpush3.msra.mxu0 %v1807_v33 }
 0x335   : > { %2291 = vmatprep.subr.mxu0 %v2407_v11 }
 0x336   : > { %2292 = vmatpush3.msra.mxu0 %v1806_v56 }
 0x337   : > { %2293 = vmatprep.subr.mxu0 %v2407_v11 }
 0x338   : > { %2294 = vmatpush3.msra.mxu0 %v1805_v35 }
 0x339   : > { %2295 = vmatprep.subr.mxu0 %v2407_v11 }
 0x33a   : > { %2296 = vmatpush3.msra.mxu0 %v1804_v20 }
 0x33b   : > { %2298 = vmatmul.mubr.msk.f32.vlgmr.msra.gmra.mxu0 %vm1111_vm2, %v1812_v4 }
 0x3fb   : > { %v1892_v50 = vpop.f32.mrf.mxu0 }
 0x3fc   : > { %v1893_v59 = vadd.f32 %v1892_v50, %v1822_v19 }
 0x3fd   : > { %v2299_v11 = vpop.f32.mrf.mxu0 }
 0x3fe   : > { %1896 = vst [vmem:[%s652_s18] sm:$0x1] %v1893_v59 }
 0x3ff   : > { %2357 = shalt.err (!%p2354_p5)
}
 0x400   : > { %s2358_s13 = scalar_lea.hbm %s3182_s14, 16  ;;  %s2362_s18 = scalar_lea.hbm %s3230_s12, 48 }
 0x401   : > { %p2359_p7 = scmp.ne.s32.totalorder %s3182_s14, %s2358_s13  ;;  %p2363_p11 = scmp.lt.s32.totalorder %s3182_s14, %s3230_s12 }
 0x402   : > { %p2364_p12 = scmp.lt.s32.totalorder %s2362_s18, %s2358_s13 }
 0x403   : > { %p2360_p9 = pnand %p2359_p7, %p2520_p6 }
 0x404   : > { %p2365_p13 = por %p2364_p12, %p2363_p11 }
 0x405   : > { %p2361_p10 = pneg %p2360_p9 }
 0x407   : > { %p2366_p0 = pnand %p2365_p13, %p2361_p10 }
 0x409   : > { %2369 = shalt.err (!%p2366_p0)
}
 0x40a   : > { %2300 = dma.vmem_to_hbm [thread:$0]  (%p2520_p6), %s1911_s30, 16, %s3182_s14, %s1898_s21  }
 0x40b PF: > { %p2306_p1 = scmp.ge.s32.totalorder %s2404_s26, 2  ;;  %s1922_s22 = sand.u32 1, %s2392_s23  }
 0x40c   : > { %s1923_s27 = scalar_lea.sflag [#allocation8], %s1922_s22 }
 0x40d   : > { %p2303_p2 = pnand %p2306_p1, %p2524_p8 }
 0x40f   : > { %p2304_p3 = pneg %p2303_p2 }
 0x411   : > { %2387 = dma.done.wait (%p2304_p3), %s1923_s27, 16  }
 0x412   : > { %2389 = vsyncadd (%p2304_p3), %s1923_s27, 4294967280  ;;  %s3304_s26 = sld [smem:[#allocation10_spill]]  ;;  %s3306_s23 = smov %s2396_s24 }
 0x413   : > { %s3305_s28 = sld [smem:[#allocation11_spill]]  ;;  %s3307_s24 = smov %s2400_s25 }
 0x418   : > { %p24_p4 = scmp.ge.s32.totalorder %s3304_s26, 5  }
 0x419   : > { %s3308_s25 = smov %s3305_s28 }
 0x41a   :  { %26 = sbr.rel (!%p24_p4) target bundleno = 6 (0x6), region = 284 }
 0x41f   :  { %1927 = vsyncpa [#allocation8], 1 }
 0x420   :  { %1929 = vsyncpa [#allocation8 + $0x1], 1 }

</bundles_post_ra>
